<compile_context>
chip_gen: v5e
topology: v5e:2x2
jax: 0.10.0
libtpu: 0.0.40
codegen_flags: <defaults>
</compile_context>

<pallas_src>
import jax
import jax.numpy as jnp
from jax.experimental import pallas as pl
from jax.experimental.pallas import tpu as pltpu

# ----------------------------- config (small) -------------------------------
VOCAB = 64
D_MODEL = 32
N_HEADS = 4
D_KV = 8                       # per-head dim
INNER = N_HEADS * D_KV         # 32
D_FF = 64
N_LAYERS = 2
NUM_BUCKETS = 8
MAX_DIST = 16
EPS = 1e-6
BATCH = 2
SEQ = 8


# --------------------------- fused encoder kernel ---------------------------
def _rms(x, w):
    # T5LayerNorm: RMS norm (no mean subtraction, no bias).  Stays in f32.
    var = jnp.mean(x * x, axis=-1, keepdims=True)
    return x * jax.lax.rsqrt(var + EPS) * w


def _encoder_kernel(x_ref, mask_ref, bias_ref, ln1_ref, wqkv_ref, wo_ref,
                    ln2_ref, wi_ref, wo_ff_ref, lnf_ref, o_ref):
    """One grid step == one batch element.  Entire encoder runs in VMEM."""
    h = x_ref[0].astype(jnp.float32)                          # (S, D)
    # extended attention mask: (1 - mask) * -1e9, broadcast over query rows
    neg = (1.0 - mask_ref[0].astype(jnp.float32)) * -1e9       # (1, S)

    for l in range(N_LAYERS):                                  # static unroll
        # ------------------- self-attention block -------------------
        n1 = _rms(h, ln1_ref[l])                               # (S, D) f32
        # fused QKV projection: one MXU pass, bf16 operands, f32 accumulate
        qkv = jnp.dot(n1.astype(jnp.bfloat16), wqkv_ref[l],
                      preferred_element_type=jnp.float32)      # (S, 3*INNER)
        ctx_heads = []
        for hh in range(N_HEADS):                              # static unroll
            lo = hh * D_KV
            q = qkv[:, lo:lo + D_KV]                           # (S, Dk)
            k = qkv[:, INNER + lo:INNER + lo + D_KV]
            v = qkv[:, 2 * INNER + lo:2 * INNER + lo + D_KV]
            # T5 attention: NO 1/sqrt(d) scaling; additive rel-pos bias + mask
            s = jnp.dot(q.astype(jnp.bfloat16),
                        k.astype(jnp.bfloat16).T,
                        preferred_element_type=jnp.float32)    # (S, S)
            s = s + bias_ref[hh] + neg
            s = s - jnp.max(s, axis=-1, keepdims=True)
            p = jnp.exp(s)                                     # f32 softmax
            p = p * pl.reciprocal(jnp.sum(p, axis=-1, keepdims=True),
                                  approx=True)
            ctx_heads.append(jnp.dot(p.astype(jnp.bfloat16),
                                     v.astype(jnp.bfloat16),
                                     preferred_element_type=jnp.float32))
        ctx = jnp.concatenate(ctx_heads, axis=-1)              # (S, INNER)
        # out-projection + residual (stays in VMEM)
        h = h + jnp.dot(ctx.astype(jnp.bfloat16), wo_ref[l],
                        preferred_element_type=jnp.float32)

        # --------------------- feed-forward block --------------------
        n2 = _rms(h, ln2_ref[l])
        ff = jnp.dot(n2.astype(jnp.bfloat16), wi_ref[l],
                     preferred_element_type=jnp.float32)       # (S, F)
        ff = jnp.maximum(ff, 0.0)                              # ReLU (f32)
        h = h + jnp.dot(ff.astype(jnp.bfloat16), wo_ff_ref[l],
                        preferred_element_type=jnp.float32)

    # final RMSNorm; output last dim D=32 (<128 lanes) is dictated by the
    # module's (B,S,D) output shape -- single masked store per batch element.
    o_ref[0] = _rms(h, lnf_ref[...]).astype(o_ref.dtype)


# ------------------------------- glue (JAX) ---------------------------------
def relative_position_bias(rel_emb, seq_len):
    """T5 bidirectional relative position bias.  rel_emb: (NUM_BUCKETS, H)."""
    # TODO(synk): integer bucket math + embedding gather have no clean Pallas
    # equivalent; left as XLA glue (tiny, fused/const-folded under jit).
    ctx = jnp.arange(seq_len)[:, None]
    mem = jnp.arange(seq_len)[None, :]
    rel = mem - ctx                                  # (S, S)
    nb = NUM_BUCKETS // 2
    ret = (rel > 0).astype(jnp.int32) * nb
    n = jnp.abs(rel)
    max_exact = nb // 2
    is_small = n < max_exact
    val_large = max_exact + (
        jnp.log(jnp.maximum(n, 1).astype(jnp.float32) / max_exact)
        / jnp.log(MAX_DIST / max_exact) * (nb - max_exact)
    ).astype(jnp.int32)
    val_large = jnp.minimum(val_large, nb - 1)
    bucket = ret + jnp.where(is_small, n, val_large)  # (S, S)
    bias = rel_emb[bucket]                            # (S, S, H) gather
    return jnp.transpose(bias, (2, 0, 1))             # (H, S, S)


def init_params(key):
    def nrm(k, shape, scale=0.02):
        return scale * jax.random.normal(k, shape, dtype=jnp.float32)

    keys = jax.random.split(key, 6)
    return {
        "embed": nrm(keys[0], (VOCAB, D_MODEL), 1.0),
        "rel_bias": nrm(keys[1], (NUM_BUCKETS, N_HEADS)),
        "ln1": jnp.ones((N_LAYERS, 1, D_MODEL), jnp.float32),
        "ln2": jnp.ones((N_LAYERS, 1, D_MODEL), jnp.float32),
        "final_ln": jnp.ones((1, D_MODEL), jnp.float32),
        # matmul weights pre-cast to bf16 once (halves HBM/VMEM traffic,
        # native MXU dtype on v5e/v6e/v7x); accumulation stays f32 in-kernel.
        "wqkv": nrm(keys[2], (N_LAYERS, D_MODEL, 3 * INNER)).astype(jnp.bfloat16),
        "wo": nrm(keys[3], (N_LAYERS, INNER, D_MODEL)).astype(jnp.bfloat16),
        "wi": nrm(keys[4], (N_LAYERS, D_MODEL, D_FF)).astype(jnp.bfloat16),
        "wo_ff": nrm(keys[5], (N_LAYERS, D_FF, D_MODEL)).astype(jnp.bfloat16),
    }


@jax.jit
def t5_text_encoder_forward(params, input_ids, attention_mask):
    """Equivalent of TracingT5TextEncoderWrapper.forward (return_dict=False):
    returns (last_hidden_state,)."""
    B, S = input_ids.shape

    # token embedding lookup (gather -> XLA glue)
    x = params["embed"][input_ids]                               # (B, S, D)
    # shared relative position bias (layer 0 bias, reused by all layers)
    pos_bias = relative_position_bias(params["rel_bias"], S)     # (H, S, S)
    mask = attention_mask.astype(jnp.float32).reshape(B, 1, S)   # (B, 1, S)

    out = pl.pallas_call(
        _encoder_kernel,
        out_shape=jax.ShapeDtypeStruct((B, S, D_MODEL), jnp.float32),
        grid=(B,),
        in_specs=[
            pl.BlockSpec((1, S, D_MODEL), lambda b: (b, 0, 0)),            # x
            pl.BlockSpec((1, 1, S), lambda b: (b, 0, 0)),                  # mask
            pl.BlockSpec((N_HEADS, S, S), lambda b: (0, 0, 0)),            # pos bias
            pl.BlockSpec((N_LAYERS, 1, D_MODEL), lambda b: (0, 0, 0)),     # ln1
            pl.BlockSpec((N_LAYERS, D_MODEL, 3 * INNER), lambda b: (0, 0, 0)),  # wqkv
            pl.BlockSpec((N_LAYERS, INNER, D_MODEL), lambda b: (0, 0, 0)),      # wo
            pl.BlockSpec((N_LAYERS, 1, D_MODEL), lambda b: (0, 0, 0)),     # ln2
            pl.BlockSpec((N_LAYERS, D_MODEL, D_FF), lambda b: (0, 0, 0)),  # wi
            pl.BlockSpec((N_LAYERS, D_FF, D_MODEL), lambda b: (0, 0, 0)),  # wo_ff
            pl.BlockSpec((1, D_MODEL), lambda b: (0, 0)),                  # final_ln
        ],
        out_specs=pl.BlockSpec((1, S, D_MODEL), lambda b: (b, 0, 0)),
        compiler_params=pltpu.CompilerParams(
            dimension_semantics=("parallel",)),   # v7x: batch sharded over 2 TCs
    )(x, mask, pos_bias,
      params["ln1"], params["wqkv"], params["wo"],
      params["ln2"], params["wi"], params["wo_ff"], params["final_ln"])

    return (out,)                                 # return_dict=False tuple


# ---------------------------------- main -------------------------------------
if __name__ == "__main__":
    key = jax.random.PRNGKey(0)
    pkey, ikey = jax.random.split(key)

    params = init_params(pkey)
    input_ids = jax.random.randint(ikey, (BATCH, SEQ), 0, VOCAB, dtype=jnp.int32)
    attention_mask = jnp.ones((BATCH, SEQ), dtype=jnp.float32)

    (out,) = t5_text_encoder_forward(params, input_ids, attention_mask)
    out = jax.block_until_ready(out)
    assert out.shape == (BATCH, SEQ, D_MODEL)
    assert jnp.all(jnp.isfinite(out))
    print("KERNEL_OK")
</pallas_src>

<mosaic_0001>
module attributes {stable_mosaic.version = 11 : i64} {
  func.func @_encoder_kernel(%arg0: i32, %arg1: memref<1x8x32xf32, #tpu.memory_space<vmem>>, %arg2: memref<1x1x8xf32, #tpu.memory_space<vmem>>, %arg3: memref<4x8x8xf32, #tpu.memory_space<vmem>>, %arg4: memref<2x1x32xf32, #tpu.memory_space<vmem>>, %arg5: memref<2x32x96xbf16, #tpu.memory_space<vmem>>, %arg6: memref<2x32x32xbf16, #tpu.memory_space<vmem>>, %arg7: memref<2x1x32xf32, #tpu.memory_space<vmem>>, %arg8: memref<2x32x64xbf16, #tpu.memory_space<vmem>>, %arg9: memref<2x64x32xbf16, #tpu.memory_space<vmem>>, %arg10: memref<1x32xf32, #tpu.memory_space<vmem>>, %arg11: memref<1x8x32xf32, #tpu.memory_space<vmem>>) attributes {dimension_semantics = [#tpu.dimension_semantics<parallel>], iteration_bounds = array<i64: 2>, scalar_prefetch = 0 : i64, scratch_operands = 0 : i64, tpu.core_type = #tpu.core_type<tc>, window_params = [{transform_indices = @transform_0, window_bounds = array<i64: 1, 8, 32>}, {transform_indices = @transform_1, window_bounds = array<i64: 1, 1, 8>}, {pipeline_mode = #tpu.pipeline_mode<synchronous>, transform_indices = @transform_2, window_bounds = array<i64: 4, 8, 8>}, {pipeline_mode = #tpu.pipeline_mode<synchronous>, transform_indices = @transform_3, window_bounds = array<i64: 2, 1, 32>}, {pipeline_mode = #tpu.pipeline_mode<synchronous>, transform_indices = @transform_4, window_bounds = array<i64: 2, 32, 96>}, {pipeline_mode = #tpu.pipeline_mode<synchronous>, transform_indices = @transform_5, window_bounds = array<i64: 2, 32, 32>}, {pipeline_mode = #tpu.pipeline_mode<synchronous>, transform_indices = @transform_6, window_bounds = array<i64: 2, 1, 32>}, {pipeline_mode = #tpu.pipeline_mode<synchronous>, transform_indices = @transform_7, window_bounds = array<i64: 2, 32, 64>}, {pipeline_mode = #tpu.pipeline_mode<synchronous>, transform_indices = @transform_8, window_bounds = array<i64: 2, 64, 32>}, {pipeline_mode = #tpu.pipeline_mode<synchronous>, transform_indices = @transform_9, window_bounds = array<i64: 1, 32>}, {transform_indices = @transform_10, window_bounds = array<i64: 1, 8, 32>}]} {
    %c0 = arith.constant 0 : index
    %c0_0 = arith.constant 0 : index
    %c0_1 = arith.constant 0 : index
    %0 = vector.load %arg1[%c0, %c0_0, %c0_1] : memref<1x8x32xf32, #tpu.memory_space<vmem>>, vector<1x8x32xf32>
    %1 = vector.shape_cast %0 : vector<1x8x32xf32> to vector<8x32xf32>
    %c0_2 = arith.constant 0 : index
    %c0_3 = arith.constant 0 : index
    %c0_4 = arith.constant 0 : index
    %2 = vector.load %arg2[%c0_2, %c0_3, %c0_4] : memref<1x1x8xf32, #tpu.memory_space<vmem>>, vector<1x1x8xf32>
    %3 = vector.shape_cast %2 : vector<1x1x8xf32> to vector<1x8xf32>
    %cst = arith.constant 1.000000e+00 : f32
    %4 = vector.broadcast %cst : f32 to vector<1x8xf32>
    %5 = arith.subf %4, %3 : vector<1x8xf32>
    %cst_5 = arith.constant -1.000000e+09 : f32
    %6 = vector.broadcast %cst_5 : f32 to vector<1x8xf32>
    %7 = arith.mulf %5, %6 : vector<1x8xf32>
    %c0_6 = arith.constant 0 : index
    %c0_7 = arith.constant 0 : index
    %c0_8 = arith.constant 0 : index
    %8 = vector.load %arg4[%c0_6, %c0_7, %c0_8] : memref<2x1x32xf32, #tpu.memory_space<vmem>>, vector<1x1x32xf32>
    %9 = vector.shape_cast %8 : vector<1x1x32xf32> to vector<1x32xf32>
    %10 = arith.mulf %1, %1 : vector<8x32xf32>
    %cst_9 = arith.constant dense<0.000000e+00> : vector<8xf32>
    %11 = vector.multi_reduction <add>, %10, %cst_9 [1] : vector<8x32xf32> to vector<8xf32>
    %12 = vector.shape_cast %11 : vector<8xf32> to vector<8x1xf32>
    %cst_10 = arith.constant 3.200000e+01 : f32
    %13 = vector.broadcast %cst_10 : f32 to vector<8x1xf32>
    %14 = arith.divf %12, %13 : vector<8x1xf32>
    %cst_11 = arith.constant 9.99999997E-7 : f32
    %15 = vector.broadcast %cst_11 : f32 to vector<8x1xf32>
    %16 = arith.addf %14, %15 : vector<8x1xf32>
    %17 = math.rsqrt %16 : vector<8x1xf32>
    %18 = vector.broadcast %17 : vector<8x1xf32> to vector<8x32xf32>
    %19 = arith.mulf %1, %18 : vector<8x32xf32>
    %20 = vector.broadcast %9 : vector<1x32xf32> to vector<8x32xf32>
    %21 = arith.mulf %19, %20 : vector<8x32xf32>
    %22 = arith.truncf %21 : vector<8x32xf32> to vector<8x32xbf16>
    %c0_12 = arith.constant 0 : index
    %c0_13 = arith.constant 0 : index
    %c0_14 = arith.constant 0 : index
    %23 = vector.load %arg5[%c0_12, %c0_13, %c0_14] : memref<2x32x96xbf16, #tpu.memory_space<vmem>>, vector<1x32x96xbf16>
    %24 = vector.shape_cast %23 : vector<1x32x96xbf16> to vector<32x96xbf16>
    %cst_15 = arith.constant dense<0.000000e+00> : vector<8x96xf32>
    %25 = tpu.matmul %22, %24, %cst_15 {dimension_numbers = #tpu.dot_dimension_numbers<[1], [0], [0], [1], [0, 0, 1, 1], [], []>} : vector<8x32xbf16>, vector<32x96xbf16>, vector<8x96xf32> -> vector<8x96xf32>
    %26 = vector.extract_strided_slice %25 {offsets = [0, 0], sizes = [8, 8], strides = [1, 1]} : vector<8x96xf32> to vector<8x8xf32>
    %27 = vector.extract_strided_slice %25 {offsets = [0, 32], sizes = [8, 8], strides = [1, 1]} : vector<8x96xf32> to vector<8x8xf32>
    %28 = vector.extract_strided_slice %25 {offsets = [0, 64], sizes = [8, 8], strides = [1, 1]} : vector<8x96xf32> to vector<8x8xf32>
    %29 = arith.truncf %26 : vector<8x8xf32> to vector<8x8xbf16>
    %30 = arith.truncf %27 : vector<8x8xf32> to vector<8x8xbf16>
    %31 = tpu.transpose %30, [1, 0] : vector<8x8xbf16> -> vector<8x8xbf16>
    %cst_16 = arith.constant dense<0.000000e+00> : vector<8x8xf32>
    %32 = tpu.matmul %29, %31, %cst_16 {dimension_numbers = #tpu.dot_dimension_numbers<[1], [0], [0], [1], [0, 0, 1, 1], [], []>} : vector<8x8xbf16>, vector<8x8xbf16>, vector<8x8xf32> -> vector<8x8xf32>
    %c0_17 = arith.constant 0 : index
    %c0_18 = arith.constant 0 : index
    %c0_19 = arith.constant 0 : index
    %33 = vector.load %arg3[%c0_17, %c0_18, %c0_19] : memref<4x8x8xf32, #tpu.memory_space<vmem>>, vector<1x8x8xf32>
    %34 = vector.shape_cast %33 : vector<1x8x8xf32> to vector<8x8xf32>
    %35 = arith.addf %32, %34 : vector<8x8xf32>
    %36 = vector.broadcast %7 : vector<1x8xf32> to vector<8x8xf32>
    %37 = arith.addf %35, %36 : vector<8x8xf32>
    %cst_20 = arith.constant dense<0xFF800000> : vector<8xf32>
    %38 = vector.multi_reduction <maximumf>, %37, %cst_20 [1] : vector<8x8xf32> to vector<8xf32>
    %39 = vector.shape_cast %38 : vector<8xf32> to vector<8x1xf32>
    %40 = vector.broadcast %39 : vector<8x1xf32> to vector<8x8xf32>
    %41 = arith.subf %37, %40 : vector<8x8xf32>
    %42 = math.exp %41 : vector<8x8xf32>
    %cst_21 = arith.constant dense<0.000000e+00> : vector<8xf32>
    %43 = vector.multi_reduction <add>, %42, %cst_21 [1] : vector<8x8xf32> to vector<8xf32>
    %44 = vector.shape_cast %43 : vector<8xf32> to vector<8x1xf32>
    %45 = tpu.reciprocal %44 {approx = true} : vector<8x1xf32> -> vector<8x1xf32>
    %46 = vector.broadcast %45 : vector<8x1xf32> to vector<8x8xf32>
    %47 = arith.mulf %42, %46 : vector<8x8xf32>
    %48 = arith.truncf %47 : vector<8x8xf32> to vector<8x8xbf16>
    %49 = arith.truncf %28 : vector<8x8xf32> to vector<8x8xbf16>
    %cst_22 = arith.constant dense<0.000000e+00> : vector<8x8xf32>
    %50 = tpu.matmul %48, %49, %cst_22 {dimension_numbers = #tpu.dot_dimension_numbers<[1], [0], [0], [1], [0, 0, 1, 1], [], []>} : vector<8x8xbf16>, vector<8x8xbf16>, vector<8x8xf32> -> vector<8x8xf32>
    %51 = vector.extract_strided_slice %25 {offsets = [0, 8], sizes = [8, 8], strides = [1, 1]} : vector<8x96xf32> to vector<8x8xf32>
    %52 = vector.extract_strided_slice %25 {offsets = [0, 40], sizes = [8, 8], strides = [1, 1]} : vector<8x96xf32> to vector<8x8xf32>
    %53 = vector.extract_strided_slice %25 {offsets = [0, 72], sizes = [8, 8], strides = [1, 1]} : vector<8x96xf32> to vector<8x8xf32>
    %54 = arith.truncf %51 : vector<8x8xf32> to vector<8x8xbf16>
    %55 = arith.truncf %52 : vector<8x8xf32> to vector<8x8xbf16>
    %56 = tpu.transpose %55, [1, 0] : vector<8x8xbf16> -> vector<8x8xbf16>
    %cst_23 = arith.constant dense<0.000000e+00> : vector<8x8xf32>
    %57 = tpu.matmul %54, %56, %cst_23 {dimension_numbers = #tpu.dot_dimension_numbers<[1], [0], [0], [1], [0, 0, 1, 1], [], []>} : vector<8x8xbf16>, vector<8x8xbf16>, vector<8x8xf32> -> vector<8x8xf32>
    %c1 = arith.constant 1 : index
    %c0_24 = arith.constant 0 : index
    %c0_25 = arith.constant 0 : index
    %58 = vector.load %arg3[%c1, %c0_24, %c0_25] : memref<4x8x8xf32, #tpu.memory_space<vmem>>, vector<1x8x8xf32>
    %59 = vector.shape_cast %58 : vector<1x8x8xf32> to vector<8x8xf32>
    %60 = arith.addf %57, %59 : vector<8x8xf32>
    %61 = vector.broadcast %7 : vector<1x8xf32> to vector<8x8xf32>
    %62 = arith.addf %60, %61 : vector<8x8xf32>
    %cst_26 = arith.constant dense<0xFF800000> : vector<8xf32>
    %63 = vector.multi_reduction <maximumf>, %62, %cst_26 [1] : vector<8x8xf32> to vector<8xf32>
    %64 = vector.shape_cast %63 : vector<8xf32> to vector<8x1xf32>
    %65 = vector.broadcast %64 : vector<8x1xf32> to vector<8x8xf32>
    %66 = arith.subf %62, %65 : vector<8x8xf32>
    %67 = math.exp %66 : vector<8x8xf32>
    %cst_27 = arith.constant dense<0.000000e+00> : vector<8xf32>
    %68 = vector.multi_reduction <add>, %67, %cst_27 [1] : vector<8x8xf32> to vector<8xf32>
    %69 = vector.shape_cast %68 : vector<8xf32> to vector<8x1xf32>
    %70 = tpu.reciprocal %69 {approx = true} : vector<8x1xf32> -> vector<8x1xf32>
    %71 = vector.broadcast %70 : vector<8x1xf32> to vector<8x8xf32>
    %72 = arith.mulf %67, %71 : vector<8x8xf32>
    %73 = arith.truncf %72 : vector<8x8xf32> to vector<8x8xbf16>
    %74 = arith.truncf %53 : vector<8x8xf32> to vector<8x8xbf16>
    %cst_28 = arith.constant dense<0.000000e+00> : vector<8x8xf32>
    %75 = tpu.matmul %73, %74, %cst_28 {dimension_numbers = #tpu.dot_dimension_numbers<[1], [0], [0], [1], [0, 0, 1, 1], [], []>} : vector<8x8xbf16>, vector<8x8xbf16>, vector<8x8xf32> -> vector<8x8xf32>
    %76 = vector.extract_strided_slice %25 {offsets = [0, 16], sizes = [8, 8], strides = [1, 1]} : vector<8x96xf32> to vector<8x8xf32>
    %77 = vector.extract_strided_slice %25 {offsets = [0, 48], sizes = [8, 8], strides = [1, 1]} : vector<8x96xf32> to vector<8x8xf32>
    %78 = vector.extract_strided_slice %25 {offsets = [0, 80], sizes = [8, 8], strides = [1, 1]} : vector<8x96xf32> to vector<8x8xf32>
    %79 = arith.truncf %76 : vector<8x8xf32> to vector<8x8xbf16>
    %80 = arith.truncf %77 : vector<8x8xf32> to vector<8x8xbf16>
    %81 = tpu.transpose %80, [1, 0] : vector<8x8xbf16> -> vector<8x8xbf16>
    %cst_29 = arith.constant dense<0.000000e+00> : vector<8x8xf32>
    %82 = tpu.matmul %79, %81, %cst_29 {dimension_numbers = #tpu.dot_dimension_numbers<[1], [0], [0], [1], [0, 0, 1, 1], [], []>} : vector<8x8xbf16>, vector<8x8xbf16>, vector<8x8xf32> -> vector<8x8xf32>
    %c2 = arith.constant 2 : index
    %c0_30 = arith.constant 0 : index
    %c0_31 = arith.constant 0 : index
    %83 = vector.load %arg3[%c2, %c0_30, %c0_31] : memref<4x8x8xf32, #tpu.memory_space<vmem>>, vector<1x8x8xf32>
    %84 = vector.shape_cast %83 : vector<1x8x8xf32> to vector<8x8xf32>
    %85 = arith.addf %82, %84 : vector<8x8xf32>
    %86 = vector.broadcast %7 : vector<1x8xf32> to vector<8x8xf32>
    %87 = arith.addf %85, %86 : vector<8x8xf32>
    %cst_32 = arith.constant dense<0xFF800000> : vector<8xf32>
    %88 = vector.multi_reduction <maximumf>, %87, %cst_32 [1] : vector<8x8xf32> to vector<8xf32>
    %89 = vector.shape_cast %88 : vector<8xf32> to vector<8x1xf32>
    %90 = vector.broadcast %89 : vector<8x1xf32> to vector<8x8xf32>
    %91 = arith.subf %87, %90 : vector<8x8xf32>
    %92 = math.exp %91 : vector<8x8xf32>
    %cst_33 = arith.constant dense<0.000000e+00> : vector<8xf32>
    %93 = vector.multi_reduction <add>, %92, %cst_33 [1] : vector<8x8xf32> to vector<8xf32>
    %94 = vector.shape_cast %93 : vector<8xf32> to vector<8x1xf32>
    %95 = tpu.reciprocal %94 {approx = true} : vector<8x1xf32> -> vector<8x1xf32>
    %96 = vector.broadcast %95 : vector<8x1xf32> to vector<8x8xf32>
    %97 = arith.mulf %92, %96 : vector<8x8xf32>
    %98 = arith.truncf %97 : vector<8x8xf32> to vector<8x8xbf16>
    %99 = arith.truncf %78 : vector<8x8xf32> to vector<8x8xbf16>
    %cst_34 = arith.constant dense<0.000000e+00> : vector<8x8xf32>
    %100 = tpu.matmul %98, %99, %cst_34 {dimension_numbers = #tpu.dot_dimension_numbers<[1], [0], [0], [1], [0, 0, 1, 1], [], []>} : vector<8x8xbf16>, vector<8x8xbf16>, vector<8x8xf32> -> vector<8x8xf32>
    %101 = vector.extract_strided_slice %25 {offsets = [0, 24], sizes = [8, 8], strides = [1, 1]} : vector<8x96xf32> to vector<8x8xf32>
    %102 = vector.extract_strided_slice %25 {offsets = [0, 56], sizes = [8, 8], strides = [1, 1]} : vector<8x96xf32> to vector<8x8xf32>
    %103 = vector.extract_strided_slice %25 {offsets = [0, 88], sizes = [8, 8], strides = [1, 1]} : vector<8x96xf32> to vector<8x8xf32>
    %104 = arith.truncf %101 : vector<8x8xf32> to vector<8x8xbf16>
    %105 = arith.truncf %102 : vector<8x8xf32> to vector<8x8xbf16>
    %106 = tpu.transpose %105, [1, 0] : vector<8x8xbf16> -> vector<8x8xbf16>
    %cst_35 = arith.constant dense<0.000000e+00> : vector<8x8xf32>
    %107 = tpu.matmul %104, %106, %cst_35 {dimension_numbers = #tpu.dot_dimension_numbers<[1], [0], [0], [1], [0, 0, 1, 1], [], []>} : vector<8x8xbf16>, vector<8x8xbf16>, vector<8x8xf32> -> vector<8x8xf32>
    %c3 = arith.constant 3 : index
    %c0_36 = arith.constant 0 : index
    %c0_37 = arith.constant 0 : index
    %108 = vector.load %arg3[%c3, %c0_36, %c0_37] : memref<4x8x8xf32, #tpu.memory_space<vmem>>, vector<1x8x8xf32>
    %109 = vector.shape_cast %108 : vector<1x8x8xf32> to vector<8x8xf32>
    %110 = arith.addf %107, %109 : vector<8x8xf32>
    %111 = vector.broadcast %7 : vector<1x8xf32> to vector<8x8xf32>
    %112 = arith.addf %110, %111 : vector<8x8xf32>
    %cst_38 = arith.constant dense<0xFF800000> : vector<8xf32>
    %113 = vector.multi_reduction <maximumf>, %112, %cst_38 [1] : vector<8x8xf32> to vector<8xf32>
    %114 = vector.shape_cast %113 : vector<8xf32> to vector<8x1xf32>
    %115 = vector.broadcast %114 : vector<8x1xf32> to vector<8x8xf32>
    %116 = arith.subf %112, %115 : vector<8x8xf32>
    %117 = math.exp %116 : vector<8x8xf32>
    %cst_39 = arith.constant dense<0.000000e+00> : vector<8xf32>
    %118 = vector.multi_reduction <add>, %117, %cst_39 [1] : vector<8x8xf32> to vector<8xf32>
    %119 = vector.shape_cast %118 : vector<8xf32> to vector<8x1xf32>
    %120 = tpu.reciprocal %119 {approx = true} : vector<8x1xf32> -> vector<8x1xf32>
    %121 = vector.broadcast %120 : vector<8x1xf32> to vector<8x8xf32>
    %122 = arith.mulf %117, %121 : vector<8x8xf32>
    %123 = arith.truncf %122 : vector<8x8xf32> to vector<8x8xbf16>
    %124 = arith.truncf %103 : vector<8x8xf32> to vector<8x8xbf16>
    %cst_40 = arith.constant dense<0.000000e+00> : vector<8x8xf32>
    %125 = tpu.matmul %123, %124, %cst_40 {dimension_numbers = #tpu.dot_dimension_numbers<[1], [0], [0], [1], [0, 0, 1, 1], [], []>} : vector<8x8xbf16>, vector<8x8xbf16>, vector<8x8xf32> -> vector<8x8xf32>
    %126 = tpu.concatenate %50, %75, %100, %125 in 1 : vector<8x8xf32>, vector<8x8xf32>, vector<8x8xf32>, vector<8x8xf32> -> vector<8x32xf32>
    %127 = arith.truncf %126 : vector<8x32xf32> to vector<8x32xbf16>
    %c0_41 = arith.constant 0 : index
    %c0_42 = arith.constant 0 : index
    %c0_43 = arith.constant 0 : index
    %128 = vector.load %arg6[%c0_41, %c0_42, %c0_43] : memref<2x32x32xbf16, #tpu.memory_space<vmem>>, vector<1x32x32xbf16>
    %129 = vector.shape_cast %128 : vector<1x32x32xbf16> to vector<32x32xbf16>
    %cst_44 = arith.constant dense<0.000000e+00> : vector<8x32xf32>
    %130 = tpu.matmul %127, %129, %cst_44 {dimension_numbers = #tpu.dot_dimension_numbers<[1], [0], [0], [1], [0, 0, 1, 1], [], []>} : vector<8x32xbf16>, vector<32x32xbf16>, vector<8x32xf32> -> vector<8x32xf32>
    %131 = arith.addf %1, %130 : vector<8x32xf32>
    %c0_45 = arith.constant 0 : index
    %c0_46 = arith.constant 0 : index
    %c0_47 = arith.constant 0 : index
    %132 = vector.load %arg7[%c0_45, %c0_46, %c0_47] : memref<2x1x32xf32, #tpu.memory_space<vmem>>, vector<1x1x32xf32>
    %133 = vector.shape_cast %132 : vector<1x1x32xf32> to vector<1x32xf32>
    %134 = arith.mulf %131, %131 : vector<8x32xf32>
    %cst_48 = arith.constant dense<0.000000e+00> : vector<8xf32>
    %135 = vector.multi_reduction <add>, %134, %cst_48 [1] : vector<8x32xf32> to vector<8xf32>
    %136 = vector.shape_cast %135 : vector<8xf32> to vector<8x1xf32>
    %cst_49 = arith.constant 3.200000e+01 : f32
    %137 = vector.broadcast %cst_49 : f32 to vector<8x1xf32>
    %138 = arith.divf %136, %137 : vector<8x1xf32>
    %cst_50 = arith.constant 9.99999997E-7 : f32
    %139 = vector.broadcast %cst_50 : f32 to vector<8x1xf32>
    %140 = arith.addf %138, %139 : vector<8x1xf32>
    %141 = math.rsqrt %140 : vector<8x1xf32>
    %142 = vector.broadcast %141 : vector<8x1xf32> to vector<8x32xf32>
    %143 = arith.mulf %131, %142 : vector<8x32xf32>
    %144 = vector.broadcast %133 : vector<1x32xf32> to vector<8x32xf32>
    %145 = arith.mulf %143, %144 : vector<8x32xf32>
    %146 = arith.truncf %145 : vector<8x32xf32> to vector<8x32xbf16>
    %c0_51 = arith.constant 0 : index
    %c0_52 = arith.constant 0 : index
    %c0_53 = arith.constant 0 : index
    %147 = vector.load %arg8[%c0_51, %c0_52, %c0_53] : memref<2x32x64xbf16, #tpu.memory_space<vmem>>, vector<1x32x64xbf16>
    %148 = vector.shape_cast %147 : vector<1x32x64xbf16> to vector<32x64xbf16>
    %cst_54 = arith.constant dense<0.000000e+00> : vector<8x64xf32>
    %149 = tpu.matmul %146, %148, %cst_54 {dimension_numbers = #tpu.dot_dimension_numbers<[1], [0], [0], [1], [0, 0, 1, 1], [], []>} : vector<8x32xbf16>, vector<32x64xbf16>, vector<8x64xf32> -> vector<8x64xf32>
    %cst_55 = arith.constant 0.000000e+00 : f32
    %150 = vector.broadcast %cst_55 : f32 to vector<8x64xf32>
    %151 = arith.maximumf %149, %150 : vector<8x64xf32>
    %152 = arith.truncf %151 : vector<8x64xf32> to vector<8x64xbf16>
    %c0_56 = arith.constant 0 : index
    %c0_57 = arith.constant 0 : index
    %c0_58 = arith.constant 0 : index
    %153 = vector.load %arg9[%c0_56, %c0_57, %c0_58] : memref<2x64x32xbf16, #tpu.memory_space<vmem>>, vector<1x64x32xbf16>
    %154 = vector.shape_cast %153 : vector<1x64x32xbf16> to vector<64x32xbf16>
    %cst_59 = arith.constant dense<0.000000e+00> : vector<8x32xf32>
    %155 = tpu.matmul %152, %154, %cst_59 {dimension_numbers = #tpu.dot_dimension_numbers<[1], [0], [0], [1], [0, 0, 1, 1], [], []>} : vector<8x64xbf16>, vector<64x32xbf16>, vector<8x32xf32> -> vector<8x32xf32>
    %156 = arith.addf %131, %155 : vector<8x32xf32>
    %c1_60 = arith.constant 1 : index
    %c0_61 = arith.constant 0 : index
    %c0_62 = arith.constant 0 : index
    %157 = vector.load %arg4[%c1_60, %c0_61, %c0_62] : memref<2x1x32xf32, #tpu.memory_space<vmem>>, vector<1x1x32xf32>
    %158 = vector.shape_cast %157 : vector<1x1x32xf32> to vector<1x32xf32>
    %159 = arith.mulf %156, %156 : vector<8x32xf32>
    %cst_63 = arith.constant dense<0.000000e+00> : vector<8xf32>
    %160 = vector.multi_reduction <add>, %159, %cst_63 [1] : vector<8x32xf32> to vector<8xf32>
    %161 = vector.shape_cast %160 : vector<8xf32> to vector<8x1xf32>
    %cst_64 = arith.constant 3.200000e+01 : f32
    %162 = vector.broadcast %cst_64 : f32 to vector<8x1xf32>
    %163 = arith.divf %161, %162 : vector<8x1xf32>
    %cst_65 = arith.constant 9.99999997E-7 : f32
    %164 = vector.broadcast %cst_65 : f32 to vector<8x1xf32>
    %165 = arith.addf %163, %164 : vector<8x1xf32>
    %166 = math.rsqrt %165 : vector<8x1xf32>
    %167 = vector.broadcast %166 : vector<8x1xf32> to vector<8x32xf32>
    %168 = arith.mulf %156, %167 : vector<8x32xf32>
    %169 = vector.broadcast %158 : vector<1x32xf32> to vector<8x32xf32>
    %170 = arith.mulf %168, %169 : vector<8x32xf32>
    %171 = arith.truncf %170 : vector<8x32xf32> to vector<8x32xbf16>
    %c1_66 = arith.constant 1 : index
    %c0_67 = arith.constant 0 : index
    %c0_68 = arith.constant 0 : index
    %172 = vector.load %arg5[%c1_66, %c0_67, %c0_68] : memref<2x32x96xbf16, #tpu.memory_space<vmem>>, vector<1x32x96xbf16>
    %173 = vector.shape_cast %172 : vector<1x32x96xbf16> to vector<32x96xbf16>
    %cst_69 = arith.constant dense<0.000000e+00> : vector<8x96xf32>
    %174 = tpu.matmul %171, %173, %cst_69 {dimension_numbers = #tpu.dot_dimension_numbers<[1], [0], [0], [1], [0, 0, 1, 1], [], []>} : vector<8x32xbf16>, vector<32x96xbf16>, vector<8x96xf32> -> vector<8x96xf32>
    %175 = vector.extract_strided_slice %174 {offsets = [0, 0], sizes = [8, 8], strides = [1, 1]} : vector<8x96xf32> to vector<8x8xf32>
    %176 = vector.extract_strided_slice %174 {offsets = [0, 32], sizes = [8, 8], strides = [1, 1]} : vector<8x96xf32> to vector<8x8xf32>
    %177 = vector.extract_strided_slice %174 {offsets = [0, 64], sizes = [8, 8], strides = [1, 1]} : vector<8x96xf32> to vector<8x8xf32>
    %178 = arith.truncf %175 : vector<8x8xf32> to vector<8x8xbf16>
    %179 = arith.truncf %176 : vector<8x8xf32> to vector<8x8xbf16>
    %180 = tpu.transpose %179, [1, 0] : vector<8x8xbf16> -> vector<8x8xbf16>
    %cst_70 = arith.constant dense<0.000000e+00> : vector<8x8xf32>
    %181 = tpu.matmul %178, %180, %cst_70 {dimension_numbers = #tpu.dot_dimension_numbers<[1], [0], [0], [1], [0, 0, 1, 1], [], []>} : vector<8x8xbf16>, vector<8x8xbf16>, vector<8x8xf32> -> vector<8x8xf32>
    %c0_71 = arith.constant 0 : index
    %c0_72 = arith.constant 0 : index
    %c0_73 = arith.constant 0 : index
    %182 = vector.load %arg3[%c0_71, %c0_72, %c0_73] : memref<4x8x8xf32, #tpu.memory_space<vmem>>, vector<1x8x8xf32>
    %183 = vector.shape_cast %182 : vector<1x8x8xf32> to vector<8x8xf32>
    %184 = arith.addf %181, %183 : vector<8x8xf32>
    %185 = vector.broadcast %7 : vector<1x8xf32> to vector<8x8xf32>
    %186 = arith.addf %184, %185 : vector<8x8xf32>
    %cst_74 = arith.constant dense<0xFF800000> : vector<8xf32>
    %187 = vector.multi_reduction <maximumf>, %186, %cst_74 [1] : vector<8x8xf32> to vector<8xf32>
    %188 = vector.shape_cast %187 : vector<8xf32> to vector<8x1xf32>
    %189 = vector.broadcast %188 : vector<8x1xf32> to vector<8x8xf32>
    %190 = arith.subf %186, %189 : vector<8x8xf32>
    %191 = math.exp %190 : vector<8x8xf32>
    %cst_75 = arith.constant dense<0.000000e+00> : vector<8xf32>
    %192 = vector.multi_reduction <add>, %191, %cst_75 [1] : vector<8x8xf32> to vector<8xf32>
    %193 = vector.shape_cast %192 : vector<8xf32> to vector<8x1xf32>
    %194 = tpu.reciprocal %193 {approx = true} : vector<8x1xf32> -> vector<8x1xf32>
    %195 = vector.broadcast %194 : vector<8x1xf32> to vector<8x8xf32>
    %196 = arith.mulf %191, %195 : vector<8x8xf32>
    %197 = arith.truncf %196 : vector<8x8xf32> to vector<8x8xbf16>
    %198 = arith.truncf %177 : vector<8x8xf32> to vector<8x8xbf16>
    %cst_76 = arith.constant dense<0.000000e+00> : vector<8x8xf32>
    %199 = tpu.matmul %197, %198, %cst_76 {dimension_numbers = #tpu.dot_dimension_numbers<[1], [0], [0], [1], [0, 0, 1, 1], [], []>} : vector<8x8xbf16>, vector<8x8xbf16>, vector<8x8xf32> -> vector<8x8xf32>
    %200 = vector.extract_strided_slice %174 {offsets = [0, 8], sizes = [8, 8], strides = [1, 1]} : vector<8x96xf32> to vector<8x8xf32>
    %201 = vector.extract_strided_slice %174 {offsets = [0, 40], sizes = [8, 8], strides = [1, 1]} : vector<8x96xf32> to vector<8x8xf32>
    %202 = vector.extract_strided_slice %174 {offsets = [0, 72], sizes = [8, 8], strides = [1, 1]} : vector<8x96xf32> to vector<8x8xf32>
    %203 = arith.truncf %200 : vector<8x8xf32> to vector<8x8xbf16>
    %204 = arith.truncf %201 : vector<8x8xf32> to vector<8x8xbf16>
    %205 = tpu.transpose %204, [1, 0] : vector<8x8xbf16> -> vector<8x8xbf16>
    %cst_77 = arith.constant dense<0.000000e+00> : vector<8x8xf32>
    %206 = tpu.matmul %203, %205, %cst_77 {dimension_numbers = #tpu.dot_dimension_numbers<[1], [0], [0], [1], [0, 0, 1, 1], [], []>} : vector<8x8xbf16>, vector<8x8xbf16>, vector<8x8xf32> -> vector<8x8xf32>
    %c1_78 = arith.constant 1 : index
    %c0_79 = arith.constant 0 : index
    %c0_80 = arith.constant 0 : index
    %207 = vector.load %arg3[%c1_78, %c0_79, %c0_80] : memref<4x8x8xf32, #tpu.memory_space<vmem>>, vector<1x8x8xf32>
    %208 = vector.shape_cast %207 : vector<1x8x8xf32> to vector<8x8xf32>
    %209 = arith.addf %206, %208 : vector<8x8xf32>
    %210 = vector.broadcast %7 : vector<1x8xf32> to vector<8x8xf32>
    %211 = arith.addf %209, %210 : vector<8x8xf32>
    %cst_81 = arith.constant dense<0xFF800000> : vector<8xf32>
    %212 = vector.multi_reduction <maximumf>, %211, %cst_81 [1] : vector<8x8xf32> to vector<8xf32>
    %213 = vector.shape_cast %212 : vector<8xf32> to vector<8x1xf32>
    %214 = vector.broadcast %213 : vector<8x1xf32> to vector<8x8xf32>
    %215 = arith.subf %211, %214 : vector<8x8xf32>
    %216 = math.exp %215 : vector<8x8xf32>
    %cst_82 = arith.constant dense<0.000000e+00> : vector<8xf32>
    %217 = vector.multi_reduction <add>, %216, %cst_82 [1] : vector<8x8xf32> to vector<8xf32>
    %218 = vector.shape_cast %217 : vector<8xf32> to vector<8x1xf32>
    %219 = tpu.reciprocal %218 {approx = true} : vector<8x1xf32> -> vector<8x1xf32>
    %220 = vector.broadcast %219 : vector<8x1xf32> to vector<8x8xf32>
    %221 = arith.mulf %216, %220 : vector<8x8xf32>
    %222 = arith.truncf %221 : vector<8x8xf32> to vector<8x8xbf16>
    %223 = arith.truncf %202 : vector<8x8xf32> to vector<8x8xbf16>
    %cst_83 = arith.constant dense<0.000000e+00> : vector<8x8xf32>
    %224 = tpu.matmul %222, %223, %cst_83 {dimension_numbers = #tpu.dot_dimension_numbers<[1], [0], [0], [1], [0, 0, 1, 1], [], []>} : vector<8x8xbf16>, vector<8x8xbf16>, vector<8x8xf32> -> vector<8x8xf32>
    %225 = vector.extract_strided_slice %174 {offsets = [0, 16], sizes = [8, 8], strides = [1, 1]} : vector<8x96xf32> to vector<8x8xf32>
    %226 = vector.extract_strided_slice %174 {offsets = [0, 48], sizes = [8, 8], strides = [1, 1]} : vector<8x96xf32> to vector<8x8xf32>
    %227 = vector.extract_strided_slice %174 {offsets = [0, 80], sizes = [8, 8], strides = [1, 1]} : vector<8x96xf32> to vector<8x8xf32>
    %228 = arith.truncf %225 : vector<8x8xf32> to vector<8x8xbf16>
    %229 = arith.truncf %226 : vector<8x8xf32> to vector<8x8xbf16>
    %230 = tpu.transpose %229, [1, 0] : vector<8x8xbf16> -> vector<8x8xbf16>
    %cst_84 = arith.constant dense<0.000000e+00> : vector<8x8xf32>
    %231 = tpu.matmul %228, %230, %cst_84 {dimension_numbers = #tpu.dot_dimension_numbers<[1], [0], [0], [1], [0, 0, 1, 1], [], []>} : vector<8x8xbf16>, vector<8x8xbf16>, vector<8x8xf32> -> vector<8x8xf32>
    %c2_85 = arith.constant 2 : index
    %c0_86 = arith.constant 0 : index
    %c0_87 = arith.constant 0 : index
    %232 = vector.load %arg3[%c2_85, %c0_86, %c0_87] : memref<4x8x8xf32, #tpu.memory_space<vmem>>, vector<1x8x8xf32>
    %233 = vector.shape_cast %232 : vector<1x8x8xf32> to vector<8x8xf32>
    %234 = arith.addf %231, %233 : vector<8x8xf32>
    %235 = vector.broadcast %7 : vector<1x8xf32> to vector<8x8xf32>
    %236 = arith.addf %234, %235 : vector<8x8xf32>
    %cst_88 = arith.constant dense<0xFF800000> : vector<8xf32>
    %237 = vector.multi_reduction <maximumf>, %236, %cst_88 [1] : vector<8x8xf32> to vector<8xf32>
    %238 = vector.shape_cast %237 : vector<8xf32> to vector<8x1xf32>
    %239 = vector.broadcast %238 : vector<8x1xf32> to vector<8x8xf32>
    %240 = arith.subf %236, %239 : vector<8x8xf32>
    %241 = math.exp %240 : vector<8x8xf32>
    %cst_89 = arith.constant dense<0.000000e+00> : vector<8xf32>
    %242 = vector.multi_reduction <add>, %241, %cst_89 [1] : vector<8x8xf32> to vector<8xf32>
    %243 = vector.shape_cast %242 : vector<8xf32> to vector<8x1xf32>
    %244 = tpu.reciprocal %243 {approx = true} : vector<8x1xf32> -> vector<8x1xf32>
    %245 = vector.broadcast %244 : vector<8x1xf32> to vector<8x8xf32>
    %246 = arith.mulf %241, %245 : vector<8x8xf32>
    %247 = arith.truncf %246 : vector<8x8xf32> to vector<8x8xbf16>
    %248 = arith.truncf %227 : vector<8x8xf32> to vector<8x8xbf16>
    %cst_90 = arith.constant dense<0.000000e+00> : vector<8x8xf32>
    %249 = tpu.matmul %247, %248, %cst_90 {dimension_numbers = #tpu.dot_dimension_numbers<[1], [0], [0], [1], [0, 0, 1, 1], [], []>} : vector<8x8xbf16>, vector<8x8xbf16>, vector<8x8xf32> -> vector<8x8xf32>
    %250 = vector.extract_strided_slice %174 {offsets = [0, 24], sizes = [8, 8], strides = [1, 1]} : vector<8x96xf32> to vector<8x8xf32>
    %251 = vector.extract_strided_slice %174 {offsets = [0, 56], sizes = [8, 8], strides = [1, 1]} : vector<8x96xf32> to vector<8x8xf32>
    %252 = vector.extract_strided_slice %174 {offsets = [0, 88], sizes = [8, 8], strides = [1, 1]} : vector<8x96xf32> to vector<8x8xf32>
    %253 = arith.truncf %250 : vector<8x8xf32> to vector<8x8xbf16>
    %254 = arith.truncf %251 : vector<8x8xf32> to vector<8x8xbf16>
    %255 = tpu.transpose %254, [1, 0] : vector<8x8xbf16> -> vector<8x8xbf16>
    %cst_91 = arith.constant dense<0.000000e+00> : vector<8x8xf32>
    %256 = tpu.matmul %253, %255, %cst_91 {dimension_numbers = #tpu.dot_dimension_numbers<[1], [0], [0], [1], [0, 0, 1, 1], [], []>} : vector<8x8xbf16>, vector<8x8xbf16>, vector<8x8xf32> -> vector<8x8xf32>
    %c3_92 = arith.constant 3 : index
    %c0_93 = arith.constant 0 : index
    %c0_94 = arith.constant 0 : index
    %257 = vector.load %arg3[%c3_92, %c0_93, %c0_94] : memref<4x8x8xf32, #tpu.memory_space<vmem>>, vector<1x8x8xf32>
    %258 = vector.shape_cast %257 : vector<1x8x8xf32> to vector<8x8xf32>
    %259 = arith.addf %256, %258 : vector<8x8xf32>
    %260 = vector.broadcast %7 : vector<1x8xf32> to vector<8x8xf32>
    %261 = arith.addf %259, %260 : vector<8x8xf32>
    %cst_95 = arith.constant dense<0xFF800000> : vector<8xf32>
    %262 = vector.multi_reduction <maximumf>, %261, %cst_95 [1] : vector<8x8xf32> to vector<8xf32>
    %263 = vector.shape_cast %262 : vector<8xf32> to vector<8x1xf32>
    %264 = vector.broadcast %263 : vector<8x1xf32> to vector<8x8xf32>
    %265 = arith.subf %261, %264 : vector<8x8xf32>
    %266 = math.exp %265 : vector<8x8xf32>
    %cst_96 = arith.constant dense<0.000000e+00> : vector<8xf32>
    %267 = vector.multi_reduction <add>, %266, %cst_96 [1] : vector<8x8xf32> to vector<8xf32>
    %268 = vector.shape_cast %267 : vector<8xf32> to vector<8x1xf32>
    %269 = tpu.reciprocal %268 {approx = true} : vector<8x1xf32> -> vector<8x1xf32>
    %270 = vector.broadcast %269 : vector<8x1xf32> to vector<8x8xf32>
    %271 = arith.mulf %266, %270 : vector<8x8xf32>
    %272 = arith.truncf %271 : vector<8x8xf32> to vector<8x8xbf16>
    %273 = arith.truncf %252 : vector<8x8xf32> to vector<8x8xbf16>
    %cst_97 = arith.constant dense<0.000000e+00> : vector<8x8xf32>
    %274 = tpu.matmul %272, %273, %cst_97 {dimension_numbers = #tpu.dot_dimension_numbers<[1], [0], [0], [1], [0, 0, 1, 1], [], []>} : vector<8x8xbf16>, vector<8x8xbf16>, vector<8x8xf32> -> vector<8x8xf32>
    %275 = tpu.concatenate %199, %224, %249, %274 in 1 : vector<8x8xf32>, vector<8x8xf32>, vector<8x8xf32>, vector<8x8xf32> -> vector<8x32xf32>
    %276 = arith.truncf %275 : vector<8x32xf32> to vector<8x32xbf16>
    %c1_98 = arith.constant 1 : index
    %c0_99 = arith.constant 0 : index
    %c0_100 = arith.constant 0 : index
    %277 = vector.load %arg6[%c1_98, %c0_99, %c0_100] : memref<2x32x32xbf16, #tpu.memory_space<vmem>>, vector<1x32x32xbf16>
    %278 = vector.shape_cast %277 : vector<1x32x32xbf16> to vector<32x32xbf16>
    %cst_101 = arith.constant dense<0.000000e+00> : vector<8x32xf32>
    %279 = tpu.matmul %276, %278, %cst_101 {dimension_numbers = #tpu.dot_dimension_numbers<[1], [0], [0], [1], [0, 0, 1, 1], [], []>} : vector<8x32xbf16>, vector<32x32xbf16>, vector<8x32xf32> -> vector<8x32xf32>
    %280 = arith.addf %156, %279 : vector<8x32xf32>
    %c1_102 = arith.constant 1 : index
    %c0_103 = arith.constant 0 : index
    %c0_104 = arith.constant 0 : index
    %281 = vector.load %arg7[%c1_102, %c0_103, %c0_104] : memref<2x1x32xf32, #tpu.memory_space<vmem>>, vector<1x1x32xf32>
    %282 = vector.shape_cast %281 : vector<1x1x32xf32> to vector<1x32xf32>
    %283 = arith.mulf %280, %280 : vector<8x32xf32>
    %cst_105 = arith.constant dense<0.000000e+00> : vector<8xf32>
    %284 = vector.multi_reduction <add>, %283, %cst_105 [1] : vector<8x32xf32> to vector<8xf32>
    %285 = vector.shape_cast %284 : vector<8xf32> to vector<8x1xf32>
    %cst_106 = arith.constant 3.200000e+01 : f32
    %286 = vector.broadcast %cst_106 : f32 to vector<8x1xf32>
    %287 = arith.divf %285, %286 : vector<8x1xf32>
    %cst_107 = arith.constant 9.99999997E-7 : f32
    %288 = vector.broadcast %cst_107 : f32 to vector<8x1xf32>
    %289 = arith.addf %287, %288 : vector<8x1xf32>
    %290 = math.rsqrt %289 : vector<8x1xf32>
    %291 = vector.broadcast %290 : vector<8x1xf32> to vector<8x32xf32>
    %292 = arith.mulf %280, %291 : vector<8x32xf32>
    %293 = vector.broadcast %282 : vector<1x32xf32> to vector<8x32xf32>
    %294 = arith.mulf %292, %293 : vector<8x32xf32>
    %295 = arith.truncf %294 : vector<8x32xf32> to vector<8x32xbf16>
    %c1_108 = arith.constant 1 : index
    %c0_109 = arith.constant 0 : index
    %c0_110 = arith.constant 0 : index
    %296 = vector.load %arg8[%c1_108, %c0_109, %c0_110] : memref<2x32x64xbf16, #tpu.memory_space<vmem>>, vector<1x32x64xbf16>
    %297 = vector.shape_cast %296 : vector<1x32x64xbf16> to vector<32x64xbf16>
    %cst_111 = arith.constant dense<0.000000e+00> : vector<8x64xf32>
    %298 = tpu.matmul %295, %297, %cst_111 {dimension_numbers = #tpu.dot_dimension_numbers<[1], [0], [0], [1], [0, 0, 1, 1], [], []>} : vector<8x32xbf16>, vector<32x64xbf16>, vector<8x64xf32> -> vector<8x64xf32>
    %cst_112 = arith.constant 0.000000e+00 : f32
    %299 = vector.broadcast %cst_112 : f32 to vector<8x64xf32>
    %300 = arith.maximumf %298, %299 : vector<8x64xf32>
    %301 = arith.truncf %300 : vector<8x64xf32> to vector<8x64xbf16>
    %c1_113 = arith.constant 1 : index
    %c0_114 = arith.constant 0 : index
    %c0_115 = arith.constant 0 : index
    %302 = vector.load %arg9[%c1_113, %c0_114, %c0_115] : memref<2x64x32xbf16, #tpu.memory_space<vmem>>, vector<1x64x32xbf16>
    %303 = vector.shape_cast %302 : vector<1x64x32xbf16> to vector<64x32xbf16>
    %cst_116 = arith.constant dense<0.000000e+00> : vector<8x32xf32>
    %304 = tpu.matmul %301, %303, %cst_116 {dimension_numbers = #tpu.dot_dimension_numbers<[1], [0], [0], [1], [0, 0, 1, 1], [], []>} : vector<8x64xbf16>, vector<64x32xbf16>, vector<8x32xf32> -> vector<8x32xf32>
    %305 = arith.addf %280, %304 : vector<8x32xf32>
    %c0_117 = arith.constant 0 : index
    %c0_118 = arith.constant 0 : index
    %306 = vector.load %arg10[%c0_117, %c0_118] : memref<1x32xf32, #tpu.memory_space<vmem>>, vector<1x32xf32>
    %307 = arith.mulf %305, %305 : vector<8x32xf32>
    %cst_119 = arith.constant dense<0.000000e+00> : vector<8xf32>
    %308 = vector.multi_reduction <add>, %307, %cst_119 [1] : vector<8x32xf32> to vector<8xf32>
    %309 = vector.shape_cast %308 : vector<8xf32> to vector<8x1xf32>
    %cst_120 = arith.constant 3.200000e+01 : f32
    %310 = vector.broadcast %cst_120 : f32 to vector<8x1xf32>
    %311 = arith.divf %309, %310 : vector<8x1xf32>
    %cst_121 = arith.constant 9.99999997E-7 : f32
    %312 = vector.broadcast %cst_121 : f32 to vector<8x1xf32>
    %313 = arith.addf %311, %312 : vector<8x1xf32>
    %314 = math.rsqrt %313 : vector<8x1xf32>
    %315 = vector.broadcast %314 : vector<8x1xf32> to vector<8x32xf32>
    %316 = arith.mulf %305, %315 : vector<8x32xf32>
    %317 = vector.broadcast %306 : vector<1x32xf32> to vector<8x32xf32>
    %318 = arith.mulf %316, %317 : vector<8x32xf32>
    %c0_122 = arith.constant 0 : index
    %c0_123 = arith.constant 0 : index
    %c0_124 = arith.constant 0 : index
    %319 = vector.load %arg11[%c0_122, %c0_123, %c0_124] : memref<1x8x32xf32, #tpu.memory_space<vmem>>, vector<1x8x32xf32>
    %320 = vector.shape_cast %319 : vector<1x8x32xf32> to vector<8x32xf32>
    %321 = vector.shape_cast %318 : vector<8x32xf32> to vector<1x8x32xf32>
    tpu.vector_store %arg11[%c0_122, %c0_123, %c0_124], %321 {strides = array<i32>} : memref<1x8x32xf32, #tpu.memory_space<vmem>>, vector<1x8x32xf32>,
    return
  }
  func.func @transform_0(%arg0: i32) -> (i32, i32, i32) {
    %c0_i32 = arith.constant 0 : i32
    %c0_i32_0 = arith.constant 0 : i32
    %c0_i32_1 = arith.constant 0 : i32
    return %arg0, %c0_i32, %c0_i32_0 : i32, i32, i32
  }
  func.func @transform_1(%arg0: i32) -> (i32, i32, i32) {
    %c0_i32 = arith.constant 0 : i32
    %c0_i32_0 = arith.constant 0 : i32
    %c0_i32_1 = arith.constant 0 : i32
    return %arg0, %c0_i32, %c0_i32_0 : i32, i32, i32
  }
  func.func @transform_2(%arg0: i32) -> (i32, i32, i32) {
    %c0_i32 = arith.constant 0 : i32
    %c0_i32_0 = arith.constant 0 : i32
    %c0_i32_1 = arith.constant 0 : i32
    %c0_i32_2 = arith.constant 0 : i32
    return %c0_i32, %c0_i32_0, %c0_i32_1 : i32, i32, i32
  }
  func.func @transform_3(%arg0: i32) -> (i32, i32, i32) {
    %c0_i32 = arith.constant 0 : i32
    %c0_i32_0 = arith.constant 0 : i32
    %c0_i32_1 = arith.constant 0 : i32
    %c0_i32_2 = arith.constant 0 : i32
    return %c0_i32, %c0_i32_0, %c0_i32_1 : i32, i32, i32
  }
  func.func @transform_4(%arg0: i32) -> (i32, i32, i32) {
    %c0_i32 = arith.constant 0 : i32
    %c0_i32_0 = arith.constant 0 : i32
    %c0_i32_1 = arith.constant 0 : i32
    %c0_i32_2 = arith.constant 0 : i32
    return %c0_i32, %c0_i32_0, %c0_i32_1 : i32, i32, i32
  }
  func.func @transform_5(%arg0: i32) -> (i32, i32, i32) {
    %c0_i32 = arith.constant 0 : i32
    %c0_i32_0 = arith.constant 0 : i32
    %c0_i32_1 = arith.constant 0 : i32
    %c0_i32_2 = arith.constant 0 : i32
    return %c0_i32, %c0_i32_0, %c0_i32_1 : i32, i32, i32
  }
  func.func @transform_6(%arg0: i32) -> (i32, i32, i32) {
    %c0_i32 = arith.constant 0 : i32
    %c0_i32_0 = arith.constant 0 : i32
    %c0_i32_1 = arith.constant 0 : i32
    %c0_i32_2 = arith.constant 0 : i32
    return %c0_i32, %c0_i32_0, %c0_i32_1 : i32, i32, i32
  }
  func.func @transform_7(%arg0: i32) -> (i32, i32, i32) {
    %c0_i32 = arith.constant 0 : i32
    %c0_i32_0 = arith.constant 0 : i32
    %c0_i32_1 = arith.constant 0 : i32
    %c0_i32_2 = arith.constant 0 : i32
    return %c0_i32, %c0_i32_0, %c0_i32_1 : i32, i32, i32
  }
  func.func @transform_8(%arg0: i32) -> (i32, i32, i32) {
    %c0_i32 = arith.constant 0 : i32
    %c0_i32_0 = arith.constant 0 : i32
    %c0_i32_1 = arith.constant 0 : i32
    %c0_i32_2 = arith.constant 0 : i32
    return %c0_i32, %c0_i32_0, %c0_i32_1 : i32, i32, i32
  }
  func.func @transform_9(%arg0: i32) -> (i32, i32) {
    %c0_i32 = arith.constant 0 : i32
    %c0_i32_0 = arith.constant 0 : i32
    %c0_i32_1 = arith.constant 0 : i32
    return %c0_i32, %c0_i32_0 : i32, i32
  }
  func.func @transform_10(%arg0: i32) -> (i32, i32, i32) {
    %c0_i32 = arith.constant 0 : i32
    %c0_i32_0 = arith.constant 0 : i32
    %c0_i32_1 = arith.constant 0 : i32
    return %arg0, %c0_i32, %c0_i32_0 : i32, i32, i32
  }
}

</mosaic_0001>

<bundles_post_ra>
// kernel: t5_text_encoder_forward.1
= control target key start
LH: loop header
LB: loop body
LE: loop exit
PB: predicated region body
PF: predicated region fallthrough
CT: control target
= control target key end

     0   :  { %15 = vsyncpa [#allocation3], 0  ;;  %s2130_s0 = inlined_call_operand.vmem [shape: f32[2,8,32], index: 0, kind: input, shape index: {}]   ;;  %s2131_s1 = inlined_call_operand.vmem [shape: f32[2,1,8], index: 1, kind: input, shape index: {}]   ;;  %s2132_s2 = inlined_call_operand.vmem [shape: f32[4,8,8], index: 2, kind: input, shape index: {}]   ;;  %s2133_s3 = inlined_call_operand.vmem [shape: f32[2,1,32], index: 3, kind: input, shape index: {}]   ;;  %s2134_s4 = inlined_call_operand.vmem [shape: bf16[2,32,96], index: 4, kind: input, shape index: {}]   ;;  %s2135_s5 = inlined_call_operand.vmem [shape: bf16[2,32,32], index: 5, kind: input, shape index: {}]   ;;  %s2136_s6 = inlined_call_operand.vmem [shape: f32[2,1,32], index: 6, kind: input, shape index: {}]   ;;  %s2137_s7 = inlined_call_operand.vmem [shape: bf16[2,32,64], index: 7, kind: input, shape index: {}]   ;;  %s2138_s8 = inlined_call_operand.vmem [shape: bf16[2,64,32], index: 8, kind: input, shape index: {}]   ;;  %s2139_s9 = inlined_call_operand.vmem [shape: f32[1,32], index: 9, kind: input, shape index: {}]   ;;  %s2140_s10 = inlined_call_operand.hbm [shape: f32[2,8,32], index: 10, kind: output, shape index: {}]  }
   0x1   :  { %17 = vsyncpa [#allocation3 + $0x1], 0  ;;  %s1782_s13 = smov 0   ;;  %s1784_s14 = smov 0  }
   0x2   :  { %s1786_s15 = smov 0   ;;  %s1788_s16 = smov 0  }
   0x3 LB: > { %s1803_s17 = sadd.s32 4294967295, %s1710_s16   ;;  %s1386_s18 = sadd.s32 4294967294, %s1710_s16   ;;  %s1710_s16 = sphi %s1788_s16, %s2168_s16   ;;  %s1706_s15 = sphi %s1786_s15, %s2167_s15   ;;  %s1702_s14 = sphi %s1784_s14, %s2166_s14   ;;  %s1698_s13 = sphi %s1782_s13, %s2165_s13  }
   0x4   : > { %s1807_s19 = sadd.s32 1, %s1710_s16   ;;  %s250_s20 = sadd.s32 1, %s1706_s15 }
   0x5   : > { %s247_s21 = ssub.s32 %s1710_s16, %s1807_s19  ;;  %p260_p0 = scmp.ne.s32.totalorder %s1706_s15, %s1702_s14 }
   0x6   : > { %p248_p1 = scmp.eq.s32.totalorder %s247_s21, 0  ;;  %p261_p2 = scmp.eq.s32.totalorder %s1803_s17, 1 }
   0x7   : > { %p266_p3 = scmp.ne.s32.totalorder %s1702_s14, %s1698_s13  ;;  %p267_p4 = scmp.eq.s32.totalorder %s1386_s18, 1 }
   0x8   : > { %s1818_s22 = scalar_select %p248_p1, %s1706_s15, %s250_s20  }
   0x9   : > { %p1820_p5 = por %p261_p2, %p260_p0  ;;  %p1824_p6 = por %p267_p4, %p266_p3 }
   0xa   : > { %p1389_p7 = scmp.ge.s32.totalorder %s1710_s16, 1  ;;  %p322_p8 = scmp.lt.s32.totalorder %s1710_s16, 3 }
   0xc   : > { %p323_p9 = pnand %p1389_p7, %p322_p8 }
   0xd   : > { %p362_p10 = scmp.lt.s32.totalorder (!%p323_p9), %s1803_s17, 1  ;;  %s1714_s27 = smov (!%p323_p9), 88  }
   0xe   : > { %326 = sbr.rel (%p323_p9) target bundleno = 3393 (0xd41), region = 60  ;;  %s2143_s28 = smov (!%p323_p9), 96  }
   0xf   : > { %s2144_s30 = smov (!%p323_p9), 120   ;;  %s1718_s11 = smov (!%p323_p9), 112  }
  0x10   : > { %s2141_s12 = smov (!%p323_p9), 80   ;;  %s2147_s18 = smov (!%p323_p9), 40  }
  0x11   : > { %s2151_s20 = smov (!%p323_p9), 56  }
  0x13   : > { %s1832_s25 = scalar_select %p362_p10, %s1803_s17, 1  ;;  %vm376_vm0 = vcmask 261120   ;;  %v1712_v3 = vmov 32.0   ;;  %v1526_v7 = vld [vmem:[%s2134_s4 + $0x8] sm:$0xff]  ;;  %v1525_v9 = vld [vmem:[%s2134_s4] sm:$0xff]  ;;  %vm442_vm5 = vcmask 64512  }
  0x14   : > { %1604 = vrcp.f32 %v1712_v3  ;;  %430 = vmatpush.bf16.msra.mxu0 %v1526_v7  ;;  %v1599_v21 = vld [vmem:[%s2133_s3] ss:$0 sm:$0xff]  ;;  %v1897_v47 = vld [vmem:[%s2132_s2 + $0x8] sm:$0xff]  ;;  %v1907_v56 = vld [vmem:[%s2132_s2 + $0x10] sm:$0xff]  ;;  %vm483_vm6 = vcmask 1043456   ;;  %vm690_vm7 = vcmask 130048  }
  0x15   : > { %s1391_s26 = sshll.u32 %s1832_s25, 3  ;;  %s368_s21 = scalar_lea.vmem %s2131_s1, %s1832_s25  ;;  %v1889_v43 = vld [vmem:[%s2132_s2] sm:$0xff]  ;;  %v1914_v60 = vld [vmem:[%s2132_s2 + $0x18] sm:$0xff]  ;;  %vm692_vm8 = vcmask 195584   ;;  %vm817_vm12 = vcmask 523264  }
  0x16   : > { %s365_s29 = scalar_lea.vmem %s2130_s0, %s1391_s26  ;;  %s2142_s26 = smov 72   ;;  %v371_v40 = vld [vmem:[%s368_s21] sm:$0x1] }
  0x17   : > { %v1838_v0 = vld [vmem:[%s365_s29] sm:$0xff]  ;;  %s1716_s29 = smov 104   ;;  %v372_v41 = vsub.f32 1.0, %v371_v40  ;;  %s2145_s21 = smov 48  }
  0x18   : > { %v375_v1 = vmul.f32 %v1838_v0, %v1838_v0  ;;  %431 = vmatpush.bf16.msra.mxu0 %v1525_v9  ;;  %s2150_s25 = smov 8  }
  0x19   : > { %v373_v42 = vmul.f32 -1e+09, %v372_v41 }
  0x1a   : > { %v377_v2 = vsel %vm376_vm0, %v375_v1, 0.0  ;;  %v1605_v4 = vpop.eup %1604 }
  0x1b   : > { %378 = vadd.xlane.f32.xlu0 %v377_v2  ;;  %v381_v5 = vmul.f32 32.0, %v1605_v4  ;;  %vm385_vm1 = vweird.f32 %v1605_v4  ;;  %v1891_v44 = vperm.slane %v373_v42, 0 }
  0x1d   : > { %v382_v6 = vsub.f32 1.0, %v381_v5 }
  0x1f   : > { %v383_v8 = vmul.f32 %v1605_v4, %v382_v6 }
  0x21   : > { %v384_v10 = vadd.f32 %v1605_v4, %v383_v8 }
  0x23   : > { %v1849_v11 = vsel %vm385_vm1, %v1605_v4, %v384_v10 }
  0x8e   : > { %v379_v12 = vpop.xlane.xlu0 %378 }
  0x8f   : > { %v387_v13 = vmul.f32 %v1849_v11, %v379_v12 }
  0x91   : > { %v388_v14 = vadd.f32 1e-06, %v387_v13 }
  0x93   : > { %1606 = vrsqrt.f32 %v388_v14  ;;  %vm395_vm3 = vweird.f32 %v388_v14 }
  0x99   : > { %v1607_v15 = vpop.eup %1606 }
  0x9a   : > { %v390_v16 = vmul.f32 %v1607_v15, %v388_v14  ;;  %vm396_vm2 = vweird.f32 %v1607_v15 }
  0x9b   : > { %vm397_vm4 = vmor %vm395_vm3, %vm396_vm2 }
  0x9c   : > { %v391_v17 = vmul.f32 %v1607_v15, %v390_v16 }
  0x9e   : > { %v392_v18 = vmul.f32 0.5, %v391_v17 }
  0xa0   : > { %v393_v19 = vsub.f32 1.5, %v392_v18 }
  0xa2   : > { %v394_v20 = vmul.f32 %v1607_v15, %v393_v19 }
  0xa4   : > { %v398_v22 = vsel %vm397_vm4, %v1607_v15, %v394_v20 }
  0xa5   : > { %v399_v23 = vmul.f32 %v398_v22, %v1838_v0 }
  0xa7   : > { %v403_v24 = vmul.f32 %v1599_v21, %v399_v23 }
  0xa9   : > { %v404_v25 = vpack.c.bf16 %v403_v24, %v403_v24 }
  0xab   : > { %1400 = vmatmul.msk.bf16.vlgmr.msra.gmra.mxu0 %vm376_vm0, %v404_v25 }
 0x128   : > { %v433_v26 = vpop.f32.mrf.mxu0 }
 0x129   : > { %v1857_v27 = vpack.c.bf16 %v433_v26, %v433_v26 }
 0x12b   : > { %622 = vrot.lane.b32.xlu2 %v1857_v27, %s2142_s26  ;;  %504 = vrot.lane.b32.xlu1 %v1857_v27, %s1714_s27  ;;  %s2148_s26 = smov 16  }
 0x12c   : > { %440 = vrot.lane.b32.xlu0 %v1857_v27, %s2143_s28  ;;  %s2149_s28 = smov 24  }
 0x130   : > { %v435_v28 = vpop.f32.mrf.mxu0 }
 0x133   : > { %620 = vrot.lane.b32.xlu2 %v1857_v27, %s1716_s29  ;;  %502 = vrot.lane.b32.xlu1 %v1857_v27, %s2144_s30  ;;  %s2157_s30 = smov 80  }
 0x13b   : > { %561 = vrot.lane.b32.xlu2 %v1857_v27, %s1718_s11  ;;  %563 = vrot.lane.b32.xlu1 %v1857_v27, %s2141_s12  ;;  %s2146_s12 = smov 64  }
 0x185   : > { %v623_v29 = vpop.permute.xlu2 %622 }
 0x186   : > { %v628_v34 = vsel %vm442_vm5, %v623_v29, 0 }
 0x18d   : > { %v621_v36 = vpop.permute.xlu2 %620 }
 0x195   : > { %v562_v39 = vpop.permute.xlu2 %561 }
 0x19d   : > { %v505_v30 = vpop.permute.xlu1 %504 }
 0x19e   : > { %v441_v31 = vpop.permute.xlu0 %440  ;;  %v510_v32 = vsel %vm442_vm5, %v505_v30, 0 }
 0x19f   : > { %v447_v33 = vsel %vm442_vm5, %v441_v31, 0  ;;  %519 = vmatpush.bf16.xpose.msra.mxu3 %v510_v32 }
 0x1a0   : > { %456 = vmatpush.bf16.xpose.msra.mxu1 %v447_v33 }
 0x1a5   : > { %v503_v35 = vpop.permute.xlu1 %502 }
 0x1a6   : > { %1404 = vmatmul.msk.bf16.vlgmr.msra.gmra.mxu3 %vm442_vm5, %v503_v35 }
 0x1a7   : > { %637 = vmatpush.bf16.xpose.msrb.mxu3 %v628_v34  ;;  %1401 = vmatmul.msk.bf16.vlgmr.msra.gmra.mxu1 %vm442_vm5, %v1857_v27 }
 0x1ad   : > { %v564_v37 = vpop.permute.xlu1 %563 }
 0x1ae   : > { %v569_v38 = vsel %vm442_vm5, %v564_v37, 0 }
 0x1af   : > { %578 = vmatpush.bf16.xpose.msrb.mxu0 %v569_v38 }
 0x1b6   : > { %1407 = vmatmul.msk.bf16.vlgmr.msrb.gmra.mxu0 %vm442_vm5, %v562_v39  ;;  %1410 = vmatmul.msk.bf16.vlgmr.msrb.gmra.mxu3 %vm442_vm5, %v621_v36 }
 0x224   : > { %v458_v45 = vpop.f32.mrf.mxu1 }
 0x225   : > { %v459_v46 = vadd.f32 %v458_v45, %v1889_v43 }
 0x227   : > { %v465_v48 = vadd.f32 %v1891_v44, %v459_v46 }
 0x229   : > { %v521_v49 = vpop.f32.mrf.mxu3  ;;  %v466_v50 = vsel %vm442_vm5, %v465_v48, -inf }
 0x22a   : > { %v522_v51 = vadd.f32 %v1897_v47, %v521_v49  ;;  %467 = vmax.xlane.f32.xlu1 %v466_v50 }
 0x22c   : > { %v460_v52 = vpop.f32.mrf.mxu1  ;;  %v525_v53 = vadd.f32 %v522_v51, %v1891_v44 }
 0x22e   : > { %v526_v54 = vsel %vm442_vm5, %v525_v53, -inf }
 0x22f   : > { %527 = vmax.xlane.f32.xlu2 %v526_v54 }
 0x231   : > { %v523_v55 = vpop.f32.mrf.mxu3 }
 0x233   : > { %v580_v57 = vpop.f32.mrf.mxu0 }
 0x234   : > { %v581_v58 = vadd.f32 %v1907_v56, %v580_v57 }
 0x236   : > { %v584_v59 = vadd.f32 %v581_v58, %v1891_v44 }
 0x238   : > { %v585_v61 = vsel %vm442_vm5, %v584_v59, -inf }
 0x239   : > { %v639_v62 = vpop.f32.mrf.mxu3  ;;  %586 = vmax.xlane.f32.xlu2 %v585_v61 }
 0x23a   : > { %v640_v63 = vadd.f32 %v1914_v60, %v639_v62 }
 0x23b   : > { %v582_v1 = vpop.f32.mrf.mxu0 }
 0x23c   : > { %v643_v2 = vadd.f32 %v640_v63, %v1891_v44  ;;  %v1528_v63 = vld [vmem:[%s2135_s5 + $0x8] sm:$0xff]  ;;  %v1527_v1 = vld [vmem:[%s2135_s5] sm:$0xff] }
 0x23d   : > { %720 = vmatpush.bf16.msra.mxu0 %v1528_v63 }
 0x23e   : > { %v644_v3 = vsel %vm442_vm5, %v643_v2, -inf }
 0x23f   : > { %645 = vmax.xlane.f32.xlu0 %v644_v3 }
 0x241   : > { %v641_v4 = vpop.f32.mrf.mxu3  ;;  %721 = vmatpush.bf16.msra.mxu0 %v1527_v1 }
 0x253   : > { %478 = vrot.lane.b32.xlu0 %v1857_v27, %s2146_s12  ;;  %s2161_s12 = smov 48  }
 0x25b   : > { %656 = vrot.lane.b32.xlu0 %v1857_v27, %s2147_s18  ;;  %s2162_s18 = smov 8  }
 0x29d   : > { %v468_v5 = vpop.xlane.xlu1 %467 }
 0x29e   : > { %v469_v6 = vsub.f32 %v465_v48, %v468_v5 }
 0x2a0   : > { %v470_v7 = vmul.f32 1.442695, %v469_v6 }
 0x2a2   : > { %1608 = vpow2.f32 %v470_v7  ;;  %v528_v8 = vpop.xlane.xlu2 %527 }
 0x2a3   : > { %v529_v14 = vsub.f32 %v525_v53, %v528_v8 }
 0x2a5   : > { %v530_v16 = vmul.f32 1.442695, %v529_v14 }
 0x2a8   : > { %v1609_v9 = vpop.eup %1608 }
 0x2a9   : > { %v472_v10 = vsel %vm442_vm5, %v1609_v9, 0.0 }
 0x2aa   : > { %473 = vadd.xlane.f32.xlu1 %v472_v10 }
 0x2ac   : > { %v587_v12 = vpop.xlane.xlu2 %586 }
 0x2ad   : > { %v588_v13 = vsub.f32 %v584_v59, %v587_v12 }
 0x2af   : > { %v589_v15 = vmul.f32 1.442695, %v588_v13 }
 0x2b1   : > { %1610 = vpow2.f32 %v589_v15  ;;  %v1530_v15 = vld [vmem:[%s2137_s7 + $0x8] sm:$0xff] }
 0x2b2   : > { %v646_v17 = vpop.xlane.xlu0 %645  ;;  %1612 = vpow2.f32 %v530_v16  ;;  %v1529_v16 = vld [vmem:[%s2137_s7] sm:$0xff] }
 0x2b3   : > { %v647_v19 = vsub.f32 %v643_v2, %v646_v17  ;;  %v1534_v17 = vld [vmem:[%s2138_s8 + $0x18] sm:$0xff] }
 0x2b4   : > { %825 = vmatpush.bf16.msra.mxu3 %v1534_v17 }
 0x2b5   : > { %v648_v21 = vmul.f32 1.442695, %v647_v19 }
 0x2b7   : > { %v1611_v18 = vpop.eup %1610  ;;  %1614 = vpow2.f32 %v648_v21  ;;  %v1532_v21 = vld [vmem:[%s2138_s8 + $0x8] sm:$0xff] }
 0x2b8   : > { %v591_v20 = vsel %vm442_vm5, %v1611_v18, 0.0  ;;  %v1613_v22 = vpop.eup %1612 }
 0x2b9   : > { %592 = vadd.xlane.f32.xlu2 %v591_v20  ;;  %v532_v23 = vsel %vm442_vm5, %v1613_v22, 0.0 }
 0x2bd   : > { %v1615_v24 = vpop.eup %1614 }
 0x2be   : > { %v650_v28 = vsel %vm442_vm5, %v1615_v24, 0.0 }
 0x2c1   : > { %533 = vadd.xlane.f32.xlu2 %v532_v23 }
 0x2c3   : > { %538 = vrot.lane.b32.xlu1 %v1857_v27, %s2151_s20  ;;  %s2163_s20 = smov 24  }
 0x2c5   : > { %v479_v25 = vpop.permute.xlu0 %478 }
 0x2c6   : > { %v485_v26 = vsel %vm483_vm6, %v479_v25, 0 }
 0x2c7   : > { %494 = vmatpush.bf16.msra.mxu2 %v485_v26 }
 0x2c9   : > { %651 = vadd.xlane.f32.xlu2 %v650_v28 }
 0x2cd   : > { %v657_v34 = vpop.permute.xlu0 %656 }
 0x2ce   : > { %v662_v38 = vsel %vm483_vm6, %v657_v34, 0  ;;  %v1531_v34 = vld [vmem:[%s2138_s8] sm:$0xff] }
 0x2e1   : > { %597 = vrot.lane.b32.xlu2 %v1857_v27, %s2145_s21  ;;  %s2156_s21 = smov 72  }
 0x31d   : > { %v474_v29 = vpop.xlane.xlu1 %473 }
 0x31e   : > { %1616 = vrcp.f32 %v474_v29  ;;  %v1600_v29 = vld [vmem:[%s2136_s6] ss:$0 sm:$0xff] }
 0x324   : > { %v1617_v30 = vpop.eup %1616 }
 0x325   : > { %v476_v31 = vmul.f32 %v1617_v30, %v1609_v9 }
 0x327   : > { %v477_v32 = vpack.c.bf16 %v476_v31, %v476_v31 }
 0x329   : > { %1402 = vmatmul.msk.bf16.vlgmr.msra.gmra.mxu2 %vm442_vm5, %v477_v32 }
 0x32c   : > { %v593_v33 = vpop.xlane.xlu2 %592 }
 0x334   : > { %v534_v35 = vpop.xlane.xlu2 %533 }
 0x335   : > { %v539_v36 = vpop.permute.xlu1 %538  ;;  %1618 = vrcp.f32 %v534_v35 }
 0x336   : > { %v544_v37 = vsel %vm483_vm6, %v539_v36, 0  ;;  %1620 = vrcp.f32 %v593_v33 }
 0x337   : > { %553 = vmatpush.bf16.msrb.mxu2 %v544_v37 }
 0x33b   : > { %671 = vmatpush.bf16.msra.mxu2 %v662_v38  ;;  %v1619_v27 = vpop.eup %1618 }
 0x33c   : > { %v536_v39 = vmul.f32 %v1619_v27, %v1613_v22  ;;  %v652_v40 = vpop.xlane.xlu2 %651  ;;  %v1621_v42 = vpop.eup %1620 }
 0x33d   : > { %1622 = vrcp.f32 %v652_v40  ;;  %v595_v45 = vmul.f32 %v1621_v42, %v1611_v18 }
 0x33e   : > { %v537_v41 = vpack.c.bf16 %v536_v39, %v536_v39 }
 0x33f   : > { %v596_v50 = vpack.c.bf16 %v595_v45, %v595_v45  ;;  %v1536_v45 = vld [vmem:[%s2134_s4 + $0x18] sm:$0xff] }
 0x340   : > { %1405 = vmatmul.msk.bf16.vlgmr.msrb.gmra.mxu2 %vm442_vm5, %v537_v41 }
 0x341   : > { %885 = vmatpush.bf16.msrb.mxu2 %v1536_v45 }
 0x343   : > { %v1623_v49 = vpop.eup %1622 }
 0x344   : > { %v598_v46 = vpop.permute.xlu2 %597  ;;  %v654_v51 = vmul.f32 %v1623_v49, %v1615_v24 }
 0x345   : > { %v603_v48 = vsel %vm483_vm6, %v598_v46, 0  ;;  %v1535_v46 = vld [vmem:[%s2134_s4 + $0x10] sm:$0xff] }
 0x346   : > { %612 = vmatpush.bf16.msrb.mxu1 %v603_v48  ;;  %v655_v52 = vpack.c.bf16 %v654_v51, %v654_v51  ;;  %886 = vmatpush.bf16.msrb.mxu2 %v1535_v46 }
 0x349   : > { %1408 = vmatmul.msk.bf16.vlgmr.msrb.gmra.mxu1 %vm442_vm5, %v596_v50 }
 0x34a   : > { %776 = vmatpush.bf16.msra.mxu1 %v1530_v15 }
 0x34e   : > { %777 = vmatpush.bf16.msra.mxu1 %v1529_v16 }
 0x350   : > { %1411 = vmatmul.msk.bf16.vlgmr.msra.gmra.mxu2 %vm442_vm5, %v655_v52 }
 0x3ac   : > { %v496_v53 = vpop.f32.mrf.mxu2 }
 0x3b4   : > { %v498_v54 = vpop.f32.mrf.mxu2 }
 0x3c3   : > { %v555_v55 = vpop.f32.mrf.mxu2 }
 0x3c4   : > { %678 = vrot.lane.b32.xlu0 %v555_v55, %s2150_s25  ;;  %s2164_s25 = smov 16  }
 0x3c6   : > { %v614_v57 = vpop.f32.mrf.mxu1 }
 0x3c7   : > { %682 = vrot.lane.b32.xlu1 %v614_v57, %s2148_s26  ;;  %s2154_s26 = smov 120  }
 0x3cb   : > { %v557_v58 = vpop.f32.mrf.mxu2 }
 0x3cc   : > { %v1601_v58 = vld [vmem:[%s2133_s3 + $0x1] ss:$0 sm:$0xff] }
 0x3ce   : > { %v616_v59 = vpop.f32.mrf.mxu1 }
 0x3d3   : > { %v673_v61 = vpop.f32.mrf.mxu2 }
 0x3d4   : > { %686 = vrot.lane.b32.xlu0 %v673_v61, %s2149_s28  ;;  %s2155_s28 = smov 96  }
 0x3db   : > { %v675_v62 = vpop.f32.mrf.mxu2 }
 0x436   : > { %v679_v2 = vpop.permute.xlu0 %678 }
 0x437   : > { %v689_v4 = vsel %vm442_vm5, %v496_v53, %v679_v2 }
 0x439   : > { %v683_v3 = vpop.permute.xlu1 %682 }
 0x43a   : > { %v691_v5 = vsel %vm690_vm7, %v689_v4, %v683_v3 }
 0x446   : > { %v687_v6 = vpop.permute.xlu0 %686 }
 0x447   : > { %v693_v7 = vsel %vm692_vm8, %v691_v5, %v687_v6 }
 0x448   : > { %v694_v8 = vpack.c.bf16 %v693_v7, %v693_v7 }
 0x44a   : > { %1420 = vmatmul.msk.bf16.vlgmr.msra.gmra.mxu0 %vm376_vm0, %v694_v8 }
 0x4c7   : > { %v723_v9 = vpop.f32.mrf.mxu0 }
 0x4c8   : > { %v727_v10 = vadd.f32 %v723_v9, %v1838_v0  ;;  %v1533_v0 = vld [vmem:[%s2138_s8 + $0x10] sm:$0xff] }
 0x4c9   : > { %826 = vmatpush.bf16.msra.mxu3 %v1533_v0 }
 0x4ca   : > { %v729_v12 = vmul.f32 %v727_v10, %v727_v10 }
 0x4cc   : > { %v730_v13 = vsel %vm376_vm0, %v729_v12, 0.0 }
 0x4cd   : > { %731 = vadd.xlane.f32.xlu1 %v730_v13  ;;  %827 = vmatpush.bf16.msra.mxu3 %v1532_v21 }
 0x4cf   : > { %v725_v14 = vpop.f32.mrf.mxu0 }
 0x4d1   : > { %828 = vmatpush.bf16.msra.mxu3 %v1531_v34 }
 0x540   : > { %v732_v18 = vpop.xlane.xlu1 %731 }
 0x541   : > { %v733_v19 = vmul.f32 %v732_v18, %v1849_v11 }
 0x543   : > { %v734_v20 = vadd.f32 1e-06, %v733_v19 }
 0x545   : > { %1624 = vrsqrt.f32 %v734_v20  ;;  %vm741_vm10 = vweird.f32 %v734_v20 }
 0x54b   : > { %v1625_v22 = vpop.eup %1624 }
 0x54c   : > { %v736_v23 = vmul.f32 %v1625_v22, %v734_v20  ;;  %vm742_vm9 = vweird.f32 %v1625_v22 }
 0x54d   : > { %vm743_vm11 = vmor %vm741_vm10, %vm742_vm9 }
 0x54e   : > { %v737_v24 = vmul.f32 %v1625_v22, %v736_v23 }
 0x550   : > { %v738_v25 = vmul.f32 0.5, %v737_v24 }
 0x552   : > { %v739_v26 = vsub.f32 1.5, %v738_v25 }
 0x554   : > { %v740_v28 = vmul.f32 %v1625_v22, %v739_v26 }
 0x556   : > { %v744_v30 = vsel %vm743_vm11, %v1625_v22, %v740_v28 }
 0x557   : > { %v745_v31 = vmul.f32 %v744_v30, %v727_v10 }
 0x559   : > { %v749_v32 = vmul.f32 %v1600_v29, %v745_v31 }
 0x55b   : > { %v750_v33 = vpack.c.bf16 %v749_v32, %v749_v32 }
 0x55d   : > { %1429 = vmatmul.msk.bf16.vlgmr.msra.gmra.mxu1 %vm376_vm0, %v750_v33 }
 0x5da   : > { %v779_v35 = vpop.f32.mrf.mxu1 }
 0x5db   : > { %v783_v36 = vmax.f32 %v779_v35, 0.0 }
 0x5dd   : > { %v784_v37 = vpack.c.bf16 %v783_v36, %v783_v36 }
 0x5df   : > { %1446 = vmatmul.msk.bf16.vlgmr.msra.gmra.mxu3 %vm817_vm12, %v784_v37 }
 0x5e2   : > { %v781_v38 = vpop.f32.mrf.mxu1 }
 0x662   : > { %v830_v27 = vpop.f32.mrf.mxu3 }
 0x663   : > { %v1979_v39 = vadd.f32 %v830_v27, %v727_v10 }
 0x665   : > { %v837_v40 = vmul.f32 %v1979_v39, %v1979_v39 }
 0x667   : > { %v838_v41 = vsel %vm376_vm0, %v837_v40, 0.0 }
 0x668   : > { %839 = vadd.xlane.f32.xlu0 %v838_v41 }
 0x66a   : > { %v832_v42 = vpop.f32.mrf.mxu3 }
 0x6db   : > { %v840_v48 = vpop.xlane.xlu0 %839 }
 0x6dc   : > { %v841_v49 = vmul.f32 %v840_v48, %v1849_v11 }
 0x6de   : > { %v842_v50 = vadd.f32 1e-06, %v841_v49 }
 0x6e0   : > { %1626 = vrsqrt.f32 %v842_v50  ;;  %vm849_vm14 = vweird.f32 %v842_v50 }
 0x6e6   : > { %v1627_v51 = vpop.eup %1626 }
 0x6e7   : > { %v844_v52 = vmul.f32 %v1627_v51, %v842_v50  ;;  %vm850_vm13 = vweird.f32 %v1627_v51 }
 0x6e8   : > { %vm851_vm15 = vmor %vm849_vm14, %vm850_vm13 }
 0x6e9   : > { %v845_v53 = vmul.f32 %v1627_v51, %v844_v52 }
 0x6eb   : > { %v846_v54 = vmul.f32 0.5, %v845_v53 }
 0x6ed   : > { %v847_v55 = vsub.f32 1.5, %v846_v54 }
 0x6ef   : > { %v848_v57 = vmul.f32 %v1627_v51, %v847_v55 }
 0x6f1   : > { %v852_v59 = vsel %vm851_vm15, %v1627_v51, %v848_v57 }
 0x6f2   : > { %v853_v61 = vmul.f32 %v852_v59, %v1979_v39 }
 0x6f4   : > { %v857_v62 = vmul.f32 %v1601_v58, %v853_v61 }
 0x6f6   : > { %v858_v63 = vpack.c.bf16 %v857_v62, %v857_v62 }
 0x6f8   : > { %1460 = vmatmul.msk.bf16.vlgmr.msrb.gmra.mxu2 %vm376_vm0, %v858_v63 }
 0x77b   : > { %v888_v1 = vpop.f32.mrf.mxu2 }
 0x77c   : > { %v1996_v2 = vpack.c.bf16 %v888_v1, %v888_v1 }
 0x77e   : > { %1006 = vrot.lane.b32.xlu0 %v1996_v2, %s1718_s11  ;;  %1063 = vrot.lane.b32.xlu1 %v1996_v2, %s1716_s29  ;;  %s2159_s29 = smov 40   ;;  %s2160_s11 = smov 64  }
 0x77f   : > { %951 = vrot.lane.b32.xlu2 %v1996_v2, %s1714_s27  ;;  %s2158_s27 = smov 56  }
 0x783   : > { %v890_v3 = vpop.f32.mrf.mxu2 }
 0x787   : > { %949 = vrot.lane.b32.xlu2 %v1996_v2, %s2154_s26 }
 0x78f   : > { %894 = vrot.lane.b32.xlu2 %v1996_v2, %s2155_s28 }
 0x797   : > { %1065 = vrot.lane.b32.xlu2 %v1996_v2, %s2156_s21 }
 0x79f   : > { %1008 = vrot.lane.b32.xlu2 %v1996_v2, %s2157_s30 }
 0x7d9   : > { %v952_v4 = vpop.permute.xlu2 %951 }
 0x7da   : > { %v957_v5 = vsel %vm442_vm5, %v952_v4, 0 }
 0x7db   : > { %966 = vmatpush.bf16.xpose.msrb.mxu3 %v957_v5 }
 0x7e1   : > { %v950_v6 = vpop.permute.xlu2 %949 }
 0x7e2   : > { %1463 = vmatmul.msk.bf16.vlgmr.msrb.gmra.mxu3 %vm442_vm5, %v950_v6 }
 0x7e9   : > { %v895_v7 = vpop.permute.xlu2 %894 }
 0x7ea   : > { %v900_v8 = vsel %vm442_vm5, %v895_v7, 0 }
 0x7eb   : > { %909 = vmatpush.bf16.xpose.msrb.mxu0 %v900_v8 }
 0x7f0   : > { %v1064_v12 = vpop.permute.xlu1 %1063  ;;  %v1007_v15 = vpop.permute.xlu0 %1006 }
 0x7f1   : > { %v1066_v9 = vpop.permute.xlu2 %1065 }
 0x7f2   : > { %v1071_v10 = vsel %vm442_vm5, %v1066_v9, 0  ;;  %1461 = vmatmul.msk.bf16.vlgmr.msrb.gmra.mxu0 %vm442_vm5, %v1996_v2 }
 0x7f3   : > { %1080 = vmatpush.bf16.xpose.msra.mxu3 %v1071_v10 }
 0x7f9   : > { %v1009_v13 = vpop.permute.xlu2 %1008 }
 0x7fa   : > { %v1014_v14 = vsel %vm442_vm5, %v1009_v13, 0  ;;  %1467 = vmatmul.msk.bf16.vlgmr.msra.gmra.mxu3 %vm442_vm5, %v1064_v12 }
 0x7fb   : > { %1023 = vmatpush.bf16.xpose.msra.mxu0 %v1014_v14 }
 0x802   : > { %1465 = vmatmul.msk.bf16.vlgmr.msra.gmra.mxu0 %vm442_vm5, %v1007_v15 }
 0x865   : > { %v968_v16 = vpop.f32.mrf.mxu3 }
 0x866   : > { %v969_v17 = vadd.f32 %v1897_v47, %v968_v16 }
 0x868   : > { %v972_v0 = vadd.f32 %v969_v17, %v1891_v44 }
 0x86a   : > { %v973_v18 = vsel %vm442_vm5, %v972_v0, -inf }
 0x86b   : > { %974 = vmax.xlane.f32.xlu2 %v973_v18 }
 0x86d   : > { %v970_v19 = vpop.f32.mrf.mxu3 }
 0x86f   : > { %v911_v20 = vpop.f32.mrf.mxu0 }
 0x870   : > { %v912_v21 = vadd.f32 %v911_v20, %v1889_v43 }
 0x872   : > { %v915_v22 = vadd.f32 %v912_v21, %v1891_v44 }
 0x874   : > { %v916_v23 = vsel %vm442_vm5, %v915_v22, -inf }
 0x875   : > { %917 = vmax.xlane.f32.xlu1 %v916_v23 }
 0x877   : > { %v913_v24 = vpop.f32.mrf.mxu0 }
 0x87d   : > { %v1082_v25 = vpop.f32.mrf.mxu3 }
 0x87e   : > { %v1083_v26 = vadd.f32 %v1914_v60, %v1082_v25  ;;  %v1538_v25 = vld [vmem:[%s2135_s5 + $0x18] sm:$0xff] }
 0x87f   : > { %v1025_v28 = vpop.f32.mrf.mxu0  ;;  %1162 = vmatpush.bf16.msrb.mxu0 %v1538_v25 }
 0x880   : > { %v1026_v47 = vadd.f32 %v1907_v56, %v1025_v28  ;;  %v1086_v29 = vadd.f32 %v1083_v26, %v1891_v44  ;;  %v1537_v26 = vld [vmem:[%s2135_s5 + $0x10] sm:$0xff] }
 0x882   : > { %v1087_v30 = vsel %vm442_vm5, %v1086_v29, -inf  ;;  %v1029_v31 = vadd.f32 %v1026_v47, %v1891_v44 }
 0x883   : > { %1088 = vmax.xlane.f32.xlu0 %v1087_v30  ;;  %1163 = vmatpush.bf16.msrb.mxu0 %v1537_v26 }
 0x884   : > { %v1030_v43 = vsel %vm442_vm5, %v1029_v31, -inf }
 0x885   : > { %v1084_v32 = vpop.f32.mrf.mxu3  ;;  %1031 = vmax.xlane.f32.xlu2 %v1030_v43 }
 0x887   : > { %v1027_v33 = vpop.f32.mrf.mxu0 }
 0x897   : > { %985 = vrot.lane.b32.xlu0 %v1996_v2, %s2158_s27 }
 0x89f   : > { %1099 = vrot.lane.b32.xlu0 %v1996_v2, %s2159_s29 }
 0x8de   : > { %v975_v60 = vpop.xlane.xlu2 %974 }
 0x8df   : > { %v976_v56 = vsub.f32 %v972_v0, %v975_v60 }
 0x8e1   : > { %v977_v34 = vmul.f32 1.442695, %v976_v56 }
 0x8e3   : > { %1628 = vpow2.f32 %v977_v34 }
 0x8e8   : > { %v918_v35 = vpop.xlane.xlu1 %917 }
 0x8e9   : > { %v1629_v36 = vpop.eup %1628  ;;  %v919_v37 = vsub.f32 %v915_v22, %v918_v35 }
 0x8ea   : > { %v979_v44 = vsel %vm442_vm5, %v1629_v36, 0.0 }
 0x8eb   : > { %v920_v38 = vmul.f32 1.442695, %v919_v37  ;;  %980 = vadd.xlane.f32.xlu2 %v979_v44  ;;  %v1539_v37 = vld [vmem:[%s2137_s7 + $0x10] sm:$0xff]  ;;  %v1544_v44 = vld [vmem:[%s2138_s8 + $0x38] sm:$0xff] }
 0x8ec   : > { %1269 = vmatpush.bf16.msrb.mxu3 %v1544_v44 }
 0x8ed   : > { %1630 = vpow2.f32 %v920_v38 }
 0x8f3   : > { %v1631_v27 = vpop.eup %1630 }
 0x8f4   : > { %v922_v40 = vsel %vm442_vm5, %v1631_v27, 0.0 }
 0x8f5   : > { %923 = vadd.xlane.f32.xlu1 %v922_v40 }
 0x8f6   : > { %v1089_v41 = vpop.xlane.xlu0 %1088 }
 0x8f7   : > { %v1090_v46 = vsub.f32 %v1086_v29, %v1089_v41  ;;  %v1542_v41 = vld [vmem:[%s2138_s8 + $0x28] sm:$0xff] }
 0x8f8   : > { %v1032_v42 = vpop.xlane.xlu2 %1031 }
 0x8f9   : > { %v1033_v45 = vsub.f32 %v1029_v31, %v1032_v42  ;;  %v1091_v49 = vmul.f32 1.442695, %v1090_v46 }
 0x8fb   : > { %v1034_v48 = vmul.f32 1.442695, %v1033_v45 }
 0x8fd   : > { %1632 = vpow2.f32 %v1034_v48 }
 0x8fe   : > { %1634 = vpow2.f32 %v1091_v49 }
 0x903   : > { %v1633_v50 = vpop.eup %1632  ;;  %928 = vrot.lane.b32.xlu2 %v1996_v2, %s2160_s11 }
 0x904   : > { %v1036_v51 = vsel %vm442_vm5, %v1633_v50, 0.0  ;;  %v1635_v52 = vpop.eup %1634 }
 0x905   : > { %1037 = vadd.xlane.f32.xlu1 %v1036_v51  ;;  %v1093_v55 = vsel %vm442_vm5, %v1635_v52, 0.0  ;;  %v1602_v51 = vld [vmem:[%s2136_s6 + $0x1] ss:$0 sm:$0xff] }
 0x909   : > { %v986_v53 = vpop.permute.xlu0 %985 }
 0x90a   : > { %v991_v54 = vsel %vm483_vm6, %v986_v53, 0 }
 0x90b   : > { %1000 = vmatpush.bf16.msra.mxu2 %v991_v54 }
 0x90d   : > { %1094 = vadd.xlane.f32.xlu1 %v1093_v55 }
 0x911   : > { %v1100_v57 = vpop.permute.xlu0 %1099 }
 0x912   : > { %v1105_v58 = vsel %vm483_vm6, %v1100_v57, 0  ;;  %v1541_v57 = vld [vmem:[%s2138_s8 + $0x20] sm:$0xff] }
 0x913   : > { %1114 = vmatpush.bf16.msrb.mxu2 %v1105_v58 }
 0x926   : > { %1042 = vrot.lane.b32.xlu1 %v1996_v2, %s2161_s12  ;;  %s359_s12 = sand.u32 1, %s1702_s14  }
 0x95e   : > { %v981_v59 = vpop.xlane.xlu2 %980 }
 0x95f   : > { %1636 = vrcp.f32 %v981_v59 }
 0x965   : > { %v1637_v61 = vpop.eup %1636 }
 0x966   : > { %v983_v62 = vmul.f32 %v1637_v61, %v1629_v36  ;;  %v929_v63 = vpop.permute.xlu2 %928  ;;  %v1540_v36 = vld [vmem:[%s2137_s7 + $0x18] sm:$0xff] }
 0x967   : > { %v934_v1 = vsel %vm483_vm6, %v929_v63, 0 }
 0x968   : > { %v984_v3 = vpack.c.bf16 %v983_v62, %v983_v62  ;;  %v924_v4 = vpop.xlane.xlu1 %923  ;;  %943 = vmatpush.bf16.msrb.mxu1 %v934_v1 }
 0x969   : > { %1638 = vrcp.f32 %v924_v4 }
 0x96a   : > { %1464 = vmatmul.msk.bf16.vlgmr.msra.gmra.mxu2 %vm442_vm5, %v984_v3 }
 0x96f   : > { %v1639_v5 = vpop.eup %1638 }
 0x970   : > { %v926_v6 = vmul.f32 %v1639_v5, %v1631_v27 }
 0x972   : > { %v927_v7 = vpack.c.bf16 %v926_v6, %v926_v6 }
 0x974   : > { %1462 = vmatmul.msk.bf16.vlgmr.msrb.gmra.mxu1 %vm442_vm5, %v927_v7 }
 0x978   : > { %v1038_v8 = vpop.xlane.xlu1 %1037 }
 0x980   : > { %v1095_v2 = vpop.xlane.xlu1 %1094 }
 0x981   : > { %1640 = vrcp.f32 %v1095_v2 }
 0x982   : > { %1642 = vrcp.f32 %v1038_v8 }
 0x987   : > { %v1641_v9 = vpop.eup %1640 }
 0x988   : > { %v1097_v10 = vmul.f32 %v1641_v9, %v1635_v52  ;;  %v1643_v13 = vpop.eup %1642 }
 0x989   : > { %v1040_v14 = vmul.f32 %v1643_v13, %v1633_v50 }
 0x98a   : > { %v1098_v12 = vpack.c.bf16 %v1097_v10, %v1097_v10 }
 0x98b   : > { %v1041_v17 = vpack.c.bf16 %v1040_v14, %v1040_v14 }
 0x98c   : > { %1468 = vmatmul.msk.bf16.vlgmr.msrb.gmra.mxu2 %vm442_vm5, %v1098_v12 }
 0x998   : > { %v1043_v15 = vpop.permute.xlu1 %1042 }
 0x999   : > { %v1048_v16 = vsel %vm483_vm6, %v1043_v15, 0 }
 0x99a   : > { %1057 = vmatpush.bf16.msra.mxu1 %v1048_v16 }
 0x99d   : > { %1466 = vmatmul.msk.bf16.vlgmr.msra.gmra.mxu1 %vm442_vm5, %v1041_v17 }
 0x99e   : > { %1220 = vmatpush.bf16.msrb.mxu1 %v1540_v36 }
 0x9a2   : > { %1221 = vmatpush.bf16.msrb.mxu1 %v1539_v37 }
 0x9ed   : > { %v1002_v0 = vpop.f32.mrf.mxu2 }
 0x9ee   : > { %1121 = vrot.lane.b32.xlu2 %v1002_v0, %s2162_s18  ;;  %s1390_s18 = sshll.u32 %s359_s12, 3 }
 0x9ef   : > { %s361_s27 = scalar_lea.vmem [#allocation2], %s1390_s18  ;;  %s1668_s18 = scalar_lea.hbm %s2140_s10, 16 }
 0x9f0   : > { %s1315_s29 = sshll.u32 %s361_s27, 4  ;;  %s1316_s29 = int_to_ptr.vmem [resolvable:$true] %s1315_s29 }
 0x9f1   : > { %v945_v18 = vpop.f32.mrf.mxu1 }
 0x9f5   : > { %v1004_v19 = vpop.f32.mrf.mxu2 }
 0x9f9   : > { %v947_v20 = vpop.f32.mrf.mxu1 }
 0xa0f   : > { %v1116_v21 = vpop.f32.mrf.mxu2 }
 0xa10   : > { %1129 = vrot.lane.b32.xlu2 %v1116_v21, %s2163_s20  ;;  %s1522_s20 = sshll.u32 %s1803_s17, 3  ;;  %s1303_s17 = scalar_lea.sflag [#allocation3], %s359_s12 }
 0xa11   : > { %s1313_s28 = scalar_lea.hbm %s2140_s10, %s1522_s20 }
 0xa12   : > { %s1317_s11 = sshll.u32 %s1313_s28, 4  ;;  %s1318_s11 = int_to_ptr.hbm [resolvable:$true] %s1317_s11 }
 0xa13   : > { %s1662_s20 = sshra.s32 %s1318_s11, 4  ;;  %s1663_s20 = int_to_ptr.hbm [resolvable:$true] %s1662_s20 }
 0xa14   : > { %p1669_p0 = scmp.lt.s32.totalorder %s1663_s20, %s2140_s10 }
 0xa17   : > { %v1118_v22 = vpop.f32.mrf.mxu2 }
 0xa1a   : > { %v1059_v23 = vpop.f32.mrf.mxu1 }
 0xa1b   : > { %1125 = vrot.lane.b32.xlu0 %v1059_v23, %s2164_s25  ;;  %s1664_s25 = scalar_lea.hbm %s1663_s20, 8 }
 0xa1c   : > { %p1665_p11 = scmp.ne.s32.totalorder %s1663_s20, %s1664_s25  ;;  %p1670_p1 = scmp.lt.s32.totalorder %s1668_s18, %s1664_s25 }
 0xa1e   : > { %p1666_p12 = pnand %p1665_p11, %p1820_p5  ;;  %p1671_p2 = por %p1670_p1, %p1669_p0 }
 0xa20   : > { %p1667_p13 = pneg %p1666_p12 }
 0xa22   : > { %v1061_v24 = vpop.f32.mrf.mxu1  ;;  %p1672_p3 = pnand %p1671_p2, %p1667_p13 }
 0xa48   : > { %v1122_v28 = vpop.permute.xlu2 %1121 }
 0xa49   : > { %v1132_v47 = vsel %vm442_vm5, %v945_v18, %v1122_v28 }
 0xa6a   : > { %v1130_v30 = vpop.permute.xlu2 %1129 }
 0xa8d   : > { %v1126_v29 = vpop.permute.xlu0 %1125 }
 0xa8e   : > { %v1133_v31 = vsel %vm690_vm7, %v1132_v47, %v1126_v29 }
 0xa8f   : > { %v1134_v43 = vsel %vm692_vm8, %v1133_v31, %v1130_v30 }
 0xa90   : > { %v1135_v32 = vpack.c.bf16 %v1134_v43, %v1134_v43 }
 0xa92   : > { %1481 = vmatmul.msk.bf16.vlgmr.msrb.gmra.mxu0 %vm376_vm0, %v1135_v32 }
 0xb0f   : > { %v1165_v33 = vpop.f32.mrf.mxu0 }
 0xb10   : > { %v1169_v60 = vadd.f32 %v1165_v33, %v1979_v39  ;;  %v1543_v39 = vld [vmem:[%s2138_s8 + $0x30] sm:$0xff] }
 0xb11   : > { %1270 = vmatpush.bf16.msrb.mxu3 %v1543_v39 }
 0xb12   : > { %v1172_v56 = vmul.f32 %v1169_v60, %v1169_v60 }
 0xb14   : > { %v1173_v34 = vsel %vm376_vm0, %v1172_v56, 0.0 }
 0xb15   : > { %1174 = vadd.xlane.f32.xlu0 %v1173_v34  ;;  %1271 = vmatpush.bf16.msrb.mxu3 %v1542_v41 }
 0xb17   : > { %v1167_v35 = vpop.f32.mrf.mxu0 }
 0xb19   : > { %1272 = vmatpush.bf16.msrb.mxu3 %v1541_v57 }
 0xb88   : > { %v1175_v38 = vpop.xlane.xlu0 %1174 }
 0xb89   : > { %v1176_v27 = vmul.f32 %v1175_v38, %v1849_v11 }
 0xb8b   : > { %v1177_v40 = vadd.f32 1e-06, %v1176_v27 }
 0xb8d   : > { %1644 = vrsqrt.f32 %v1177_v40  ;;  %vm1184_vm2 = vweird.f32 %v1177_v40 }
 0xb93   : > { %v1645_v42 = vpop.eup %1644 }
 0xb94   : > { %v1179_v45 = vmul.f32 %v1645_v42, %v1177_v40  ;;  %vm1185_vm1 = vweird.f32 %v1645_v42 }
 0xb95   : > { %vm1186_vm3 = vmor %vm1184_vm2, %vm1185_vm1 }
 0xb96   : > { %v1180_v46 = vmul.f32 %v1645_v42, %v1179_v45 }
 0xb98   : > { %v1181_v48 = vmul.f32 0.5, %v1180_v46 }
 0xb9a   : > { %v1182_v49 = vsub.f32 1.5, %v1181_v48 }
 0xb9c   : > { %v1183_v50 = vmul.f32 %v1645_v42, %v1182_v49 }
 0xb9e   : > { %v1187_v52 = vsel %vm1186_vm3, %v1645_v42, %v1183_v50 }
 0xb9f   : > { %v1188_v53 = vmul.f32 %v1187_v52, %v1169_v60 }
 0xba1   : > { %v1192_v54 = vmul.f32 %v1602_v51, %v1188_v53 }
 0xba3   : > { %v1193_v55 = vpack.c.bf16 %v1192_v54, %v1192_v54 }
 0xba5   : > { %1495 = vmatmul.msk.bf16.vlgmr.msrb.gmra.mxu1 %vm376_vm0, %v1193_v55 }
 0xc22   : > { %v1223_v58 = vpop.f32.mrf.mxu1 }
 0xc23   : > { %v1227_v59 = vmax.f32 %v1223_v58, 0.0 }
 0xc25   : > { %v1228_v61 = vpack.c.bf16 %v1227_v59, %v1227_v59 }
 0xc27   : > { %1520 = vmatmul.msk.bf16.vlgmr.msrb.gmra.mxu3 %vm817_vm12, %v1228_v61 }
 0xc2a   : > { %v1225_v62 = vpop.f32.mrf.mxu1 }
 0xcaa   : > { %v1274_v63 = vpop.f32.mrf.mxu3 }
 0xcab   : > { %v1278_v1 = vadd.f32 %v1274_v63, %v1169_v60 }
 0xcad   : > { %v1280_v3 = vmul.f32 %v1278_v1, %v1278_v1 }
 0xcaf   : > { %v1281_v4 = vsel %vm376_vm0, %v1280_v3, 0.0 }
 0xcb0   : > { %1282 = vadd.xlane.f32.xlu2 %v1281_v4 }
 0xcb2   : > { %v1276_v5 = vpop.f32.mrf.mxu3 }
 0xd23   : > { %v1283_v6 = vpop.xlane.xlu2 %1282 }
 0xd24   : > { %v1284_v7 = vmul.f32 %v1283_v6, %v1849_v11  ;;  %v1603_v11 = vld [vmem:[%s2139_s9] ss:$0 sm:$0xff] }
 0xd26   : > { %v1285_v8 = vadd.f32 1e-06, %v1284_v7 }
 0xd28   : > { %1646 = vrsqrt.f32 %v1285_v8  ;;  %vm1292_vm5 = vweird.f32 %v1285_v8 }
 0xd2e   : > { %v1647_v2 = vpop.eup %1646 }
 0xd2f   : > { %v1287_v9 = vmul.f32 %v1647_v2, %v1285_v8  ;;  %vm1293_vm4 = vweird.f32 %v1647_v2 }
 0xd30   : > { %vm1294_vm6 = vmor %vm1292_vm5, %vm1293_vm4 }
 0xd31   : > { %v1288_v10 = vmul.f32 %v1647_v2, %v1287_v9 }
 0xd33   : > { %v1289_v12 = vmul.f32 0.5, %v1288_v10 }
 0xd35   : > { %v1290_v13 = vsub.f32 1.5, %v1289_v12 }
 0xd37   : > { %v1291_v14 = vmul.f32 %v1647_v2, %v1290_v13 }
 0xd39   : > { %v1295_v15 = vsel %vm1294_vm6, %v1647_v2, %v1291_v14 }
 0xd3a   : > { %v1296_v16 = vmul.f32 %v1295_v15, %v1278_v1 }
 0xd3c   : > { %v1300_v17 = vmul.f32 %v1603_v11, %v1296_v16 }
 0xd3e   : > { %1301 = vst.msk [vmem:[%s361_s27] sm:$0xff] %vm376_vm0, %v1300_v17 }
 0xd3f   : > { %1675 = shalt.err (!%p1672_p3)
}
 0xd40   : > { %1545 = dma.vmem_to_hbm [thread:$0]  (%p1820_p5), %s1316_s29, 128, %s1318_s11, %s1303_s17  }
 0xd41 PF: > { %p1551_p4 = scmp.ge.s32.totalorder %s1710_s16, 2  ;;  %s1329_s12 = sand.u32 1, %s1698_s13  }
 0xd42   : > { %s1330_s27 = scalar_lea.sflag [#allocation3], %s1329_s12 }
 0xd43   : > { %p1548_p7 = pnand %p1551_p4, %p1824_p6 }
 0xd45   : > { %p1549_p8 = pneg %p1548_p7 }
 0xd47   : > { %1693 = dma.done.wait (%p1549_p8), %s1330_s27, 128  }
 0xd48   : > { %1695 = vsyncadd (%p1549_p8), %s1330_s27, 4294967168  ;;  %p20_p9 = scmp.ge.s32.totalorder %s1807_s19, 4   ;;  %s2165_s13 = smov %s1702_s14 }
 0xd49   : > { %s2166_s14 = smov %s1706_s15  ;;  %s2167_s15 = smov %s1818_s22 }
 0xd4a   : > { %s2168_s16 = smov %s1807_s19  ;;  %22 = sbr.rel (!%p20_p9) target bundleno = 3 (0x3), region = 107 }
 0xd4f   :  { %1336 = vsyncpa [#allocation3], 1 }
 0xd50   :  { %1338 = vsyncpa [#allocation3 + $0x1], 1 }

</bundles_post_ra>
